<compile_context>
chip_gen: v5e
topology: v5e:2x2
jax: 0.10.0
libtpu: 0.0.40
codegen_flags: <defaults>
</compile_context>

<pallas_src>
import functools

import jax
import jax.numpy as jnp
from jax.experimental import pallas as pl
from jax.experimental.pallas import tpu as pltpu

NEG_SLOPE = 0.01  # nn.LeakyReLU() default negative_slope

# Logical (PyTorch) feature sizes and their MXU-padded counterparts.
D_IN, D_H, D_OUT = 400, 500, 1
PD_IN, PD_H, PD_OUT = 512, 512, 128


def _leaky_relu(x):
    # max(x, a*x) == LeakyReLU(x) for 0 < a < 1.
    return jnp.maximum(x, NEG_SLOPE * x)


def discriminator_kernel(x_ref, w1_ref, b1_ref, w2_ref, b2_ref, w3_ref, b3_ref,
                         o_ref):
    # fc1 + LeakyReLU (bf16 matmul inputs, f32 accumulation / elementwise)
    h = jnp.dot(x_ref[...], w1_ref[...], preferred_element_type=jnp.float32)
    h = _leaky_relu(h + b1_ref[...])
    # fc2 + LeakyReLU
    h = jnp.dot(h.astype(jnp.bfloat16), w2_ref[...],
                preferred_element_type=jnp.float32)
    h = _leaky_relu(h + b2_ref[...])
    # fc3 + Sigmoid (lane-dense padded output; only column 0 is meaningful)
    h = jnp.dot(h.astype(jnp.bfloat16), w3_ref[...],
                preferred_element_type=jnp.float32)
    h = h + b3_ref[...]
    o_ref[...] = jax.nn.sigmoid(h)


def _round_up(n, m):
    return ((n + m - 1) // m) * m


def init_params(key):
    """Deterministic parameter init (PyTorch-Linear-style uniform bounds).

    Weights stored as [in, out] (equivalent to PyTorch's x @ W.T + b).
    """
    def linear(key, fan_in, fan_out):
        kw, kb = jax.random.split(key)
        bound = 1.0 / (fan_in ** 0.5)
        w = jax.random.uniform(kw, (fan_in, fan_out), jnp.float32, -bound, bound)
        b = jax.random.uniform(kb, (1, fan_out), jnp.float32, -bound, bound)
        return w, b

    k1, k2, k3 = jax.random.split(key, 3)
    w1, b1 = linear(k1, D_IN, D_H)
    w2, b2 = linear(k2, D_H, D_H)
    w3, b3 = linear(k3, D_H, D_OUT)
    return (w1, b1, w2, b2, w3, b3)


def pad_params(params):
    """Zero-pad params to MXU-friendly shapes; weights bf16, biases f32."""
    w1, b1, w2, b2, w3, b3 = params

    def pad_w(w, rows, cols):
        out = jnp.zeros((rows, cols), jnp.float32)
        out = out.at[: w.shape[0], : w.shape[1]].set(w)
        return out.astype(jnp.bfloat16)

    def pad_b(b, cols):
        out = jnp.zeros((1, cols), jnp.float32)
        return out.at[:, : b.shape[1]].set(b)

    return (
        pad_w(w1, PD_IN, PD_H), pad_b(b1, PD_H),
        pad_w(w2, PD_H, PD_H), pad_b(b2, PD_H),
        pad_w(w3, PD_H, PD_OUT), pad_b(b3, PD_OUT),
    )


@functools.partial(jax.jit, static_argnames=("block_b",))
def discriminator_forward(x, padded_params, block_b=1024):
    """x: [B, 400] float32 -> [B, 1] float32."""
    w1, b1, w2, b2, w3, b3 = padded_params
    B = x.shape[0]

    # Batch tile: sized so resident weights (~1.2 MiB bf16) + double-buffered
    # x tiles + f32 intermediates fit comfortably in the 16/32 MiB scoped VMEM
    # defaults on v5e / v6e / v7x.
    tb = min(block_b, _round_up(B, 8))
    b_pad = _round_up(B, tb)
    grid_n = b_pad // tb

    # Pad input: batch to a multiple of tb, features 400 -> 512 (zero cols),
    # and cast to bf16 once in the wrapper (halves x HBM traffic).
    xp = jnp.zeros((b_pad, PD_IN), jnp.bfloat16)
    xp = xp.at[:B, :D_IN].set(x.astype(jnp.bfloat16))

    const2d = lambda shape: pl.BlockSpec(shape, lambda i: (0, 0))

    flops = 2 * b_pad * (PD_IN * PD_H + PD_H * PD_H + PD_H * PD_OUT)
    bytes_accessed = (
        xp.size * 2 + b_pad * PD_OUT * 4
        + (w1.size + w2.size + w3.size) * 2
        + (b1.size + b2.size + b3.size) * 4
    )

    out = pl.pallas_call(
        discriminator_kernel,
        out_shape=jax.ShapeDtypeStruct((b_pad, PD_OUT), jnp.float32),
        grid_spec=pltpu.PrefetchScalarGridSpec(
            num_scalar_prefetch=0,
            grid=(grid_n,),
            in_specs=[
                pl.BlockSpec((tb, PD_IN), lambda i: (i, 0)),   # x tile
                const2d(w1.shape), const2d(b1.shape),          # resident params
                const2d(w2.shape), const2d(b2.shape),
                const2d(w3.shape), const2d(b3.shape),
            ],
            out_specs=pl.BlockSpec((tb, PD_OUT), lambda i: (i, 0)),
        ),
        compiler_params=pltpu.CompilerParams(
            dimension_semantics=("parallel",),  # megacore sharding on v7x
        ),
        cost_estimate=pl.CostEstimate(
            flops=flops,
            transcendentals=b_pad * PD_OUT,
            bytes_accessed=bytes_accessed,
        ),
    )(xp, w1, b1, w2, b2, w3, b3)

    # Drop batch padding and the lane-padding columns (layout plumbing only).
    return out[:B, :D_OUT]


def reference_forward(x, params):
    """Pure-JAX f32 reference matching the PyTorch module."""
    w1, b1, w2, b2, w3, b3 = params
    h = x @ w1 + b1
    h = jnp.where(h > 0, h, NEG_SLOPE * h)
    h = h @ w2 + b2
    h = jnp.where(h > 0, h, NEG_SLOPE * h)
    return jax.nn.sigmoid(h @ w3 + b3)


if __name__ == "__main__":
    key = jax.random.PRNGKey(0)
    kp, kx = jax.random.split(key)
    params = init_params(kp)
    padded_params = pad_params(params)

    B = 8
    x = jax.random.normal(kx, (B, D_IN), jnp.float32)

    out = discriminator_forward(x, padded_params)
    out = jax.block_until_ready(out)

    ref = reference_forward(x, params)
    assert out.shape == (B, 1), out.shape
    # bf16 matmul inputs (f32 accumulation) -> allow bf16-level rounding.
    assert jnp.allclose(out, ref, atol=1e-2, rtol=1e-2), "mismatch vs reference"

    print("KERNEL_OK")
</pallas_src>

<mosaic_0001>
module attributes {stable_mosaic.version = 11 : i64} {
  func.func @discriminator_kernel(%arg0: i32, %arg1: memref<8x512xbf16, #tpu.memory_space<vmem>>, %arg2: memref<512x512xbf16, #tpu.memory_space<vmem>>, %arg3: memref<1x512xf32, #tpu.memory_space<vmem>>, %arg4: memref<512x512xbf16, #tpu.memory_space<vmem>>, %arg5: memref<1x512xf32, #tpu.memory_space<vmem>>, %arg6: memref<512x128xbf16, #tpu.memory_space<vmem>>, %arg7: memref<1x128xf32, #tpu.memory_space<vmem>>, %arg8: memref<8x128xf32, #tpu.memory_space<vmem>>) attributes {dimension_semantics = [#tpu.dimension_semantics<parallel>], iteration_bounds = array<i64: 1>, scalar_prefetch = 0 : i64, scratch_operands = 0 : i64, tpu.core_type = #tpu.core_type<tc>, window_params = [{transform_indices = @transform_0, window_bounds = array<i64: 8, 512>}, {pipeline_mode = #tpu.pipeline_mode<synchronous>, transform_indices = @transform_1, window_bounds = array<i64: 512, 512>}, {pipeline_mode = #tpu.pipeline_mode<synchronous>, transform_indices = @transform_2, window_bounds = array<i64: 1, 512>}, {pipeline_mode = #tpu.pipeline_mode<synchronous>, transform_indices = @transform_3, window_bounds = array<i64: 512, 512>}, {pipeline_mode = #tpu.pipeline_mode<synchronous>, transform_indices = @transform_4, window_bounds = array<i64: 1, 512>}, {pipeline_mode = #tpu.pipeline_mode<synchronous>, transform_indices = @transform_5, window_bounds = array<i64: 512, 128>}, {pipeline_mode = #tpu.pipeline_mode<synchronous>, transform_indices = @transform_6, window_bounds = array<i64: 1, 128>}, {transform_indices = @transform_7, window_bounds = array<i64: 8, 128>}]} {
    %c0 = arith.constant 0 : index
    %c0_0 = arith.constant 0 : index
    %0 = vector.load %arg1[%c0, %c0_0] : memref<8x512xbf16, #tpu.memory_space<vmem>>, vector<8x512xbf16>
    %c0_1 = arith.constant 0 : index
    %c0_2 = arith.constant 0 : index
    %1 = vector.load %arg2[%c0_1, %c0_2] : memref<512x512xbf16, #tpu.memory_space<vmem>>, vector<512x512xbf16>
    %cst = arith.constant dense<0.000000e+00> : vector<8x512xf32>
    %2 = tpu.matmul %0, %1, %cst {dimension_numbers = #tpu.dot_dimension_numbers<[1], [0], [0], [1], [0, 0, 1, 1], [], []>} : vector<8x512xbf16>, vector<512x512xbf16>, vector<8x512xf32> -> vector<8x512xf32>
    %c0_3 = arith.constant 0 : index
    %c0_4 = arith.constant 0 : index
    %3 = vector.load %arg3[%c0_3, %c0_4] : memref<1x512xf32, #tpu.memory_space<vmem>>, vector<1x512xf32>
    %4 = vector.broadcast %3 : vector<1x512xf32> to vector<8x512xf32>
    %5 = arith.addf %2, %4 : vector<8x512xf32>
    %cst_5 = arith.constant 0.00999999977 : f32
    %6 = vector.broadcast %cst_5 : f32 to vector<8x512xf32>
    %7 = arith.mulf %6, %5 : vector<8x512xf32>
    %8 = arith.maximumf %5, %7 : vector<8x512xf32>
    %9 = arith.truncf %8 : vector<8x512xf32> to vector<8x512xbf16>
    %c0_6 = arith.constant 0 : index
    %c0_7 = arith.constant 0 : index
    %10 = vector.load %arg4[%c0_6, %c0_7] : memref<512x512xbf16, #tpu.memory_space<vmem>>, vector<512x512xbf16>
    %cst_8 = arith.constant dense<0.000000e+00> : vector<8x512xf32>
    %11 = tpu.matmul %9, %10, %cst_8 {dimension_numbers = #tpu.dot_dimension_numbers<[1], [0], [0], [1], [0, 0, 1, 1], [], []>} : vector<8x512xbf16>, vector<512x512xbf16>, vector<8x512xf32> -> vector<8x512xf32>
    %c0_9 = arith.constant 0 : index
    %c0_10 = arith.constant 0 : index
    %12 = vector.load %arg5[%c0_9, %c0_10] : memref<1x512xf32, #tpu.memory_space<vmem>>, vector<1x512xf32>
    %13 = vector.broadcast %12 : vector<1x512xf32> to vector<8x512xf32>
    %14 = arith.addf %11, %13 : vector<8x512xf32>
    %cst_11 = arith.constant 0.00999999977 : f32
    %15 = vector.broadcast %cst_11 : f32 to vector<8x512xf32>
    %16 = arith.mulf %15, %14 : vector<8x512xf32>
    %17 = arith.maximumf %14, %16 : vector<8x512xf32>
    %18 = arith.truncf %17 : vector<8x512xf32> to vector<8x512xbf16>
    %c0_12 = arith.constant 0 : index
    %c0_13 = arith.constant 0 : index
    %19 = vector.load %arg6[%c0_12, %c0_13] : memref<512x128xbf16, #tpu.memory_space<vmem>>, vector<512x128xbf16>
    %cst_14 = arith.constant dense<0.000000e+00> : vector<8x128xf32>
    %20 = tpu.matmul %18, %19, %cst_14 {dimension_numbers = #tpu.dot_dimension_numbers<[1], [0], [0], [1], [0, 0, 1, 1], [], []>} : vector<8x512xbf16>, vector<512x128xbf16>, vector<8x128xf32> -> vector<8x128xf32>
    %c0_15 = arith.constant 0 : index
    %c0_16 = arith.constant 0 : index
    %21 = vector.load %arg7[%c0_15, %c0_16] : memref<1x128xf32, #tpu.memory_space<vmem>>, vector<1x128xf32>
    %22 = vector.broadcast %21 : vector<1x128xf32> to vector<8x128xf32>
    %23 = arith.addf %20, %22 : vector<8x128xf32>
    %24 = arith.negf %23 : vector<8x128xf32>
    %25 = math.exp %24 : vector<8x128xf32>
    %cst_17 = arith.constant 1.000000e+00 : f32
    %26 = vector.broadcast %cst_17 : f32 to vector<8x128xf32>
    %27 = arith.addf %26, %25 : vector<8x128xf32>
    %28 = arith.divf %26, %27 : vector<8x128xf32>
    %c0_18 = arith.constant 0 : index
    %c0_19 = arith.constant 0 : index
    %29 = vector.load %arg8[%c0_18, %c0_19] : memref<8x128xf32, #tpu.memory_space<vmem>>, vector<8x128xf32>
    tpu.vector_store %arg8[%c0_18, %c0_19], %28 {strides = array<i32>} : memref<8x128xf32, #tpu.memory_space<vmem>>, vector<8x128xf32>,
    return
  }
  func.func @transform_0(%arg0: i32) -> (i32, i32) {
    %c0_i32 = arith.constant 0 : i32
    %c0_i32_0 = arith.constant 0 : i32
    return %arg0, %c0_i32 : i32, i32
  }
  func.func @transform_1(%arg0: i32) -> (i32, i32) {
    %c0_i32 = arith.constant 0 : i32
    %c0_i32_0 = arith.constant 0 : i32
    %c0_i32_1 = arith.constant 0 : i32
    return %c0_i32, %c0_i32_0 : i32, i32
  }
  func.func @transform_2(%arg0: i32) -> (i32, i32) {
    %c0_i32 = arith.constant 0 : i32
    %c0_i32_0 = arith.constant 0 : i32
    %c0_i32_1 = arith.constant 0 : i32
    return %c0_i32, %c0_i32_0 : i32, i32
  }
  func.func @transform_3(%arg0: i32) -> (i32, i32) {
    %c0_i32 = arith.constant 0 : i32
    %c0_i32_0 = arith.constant 0 : i32
    %c0_i32_1 = arith.constant 0 : i32
    return %c0_i32, %c0_i32_0 : i32, i32
  }
  func.func @transform_4(%arg0: i32) -> (i32, i32) {
    %c0_i32 = arith.constant 0 : i32
    %c0_i32_0 = arith.constant 0 : i32
    %c0_i32_1 = arith.constant 0 : i32
    return %c0_i32, %c0_i32_0 : i32, i32
  }
  func.func @transform_5(%arg0: i32) -> (i32, i32) {
    %c0_i32 = arith.constant 0 : i32
    %c0_i32_0 = arith.constant 0 : i32
    %c0_i32_1 = arith.constant 0 : i32
    return %c0_i32, %c0_i32_0 : i32, i32
  }
  func.func @transform_6(%arg0: i32) -> (i32, i32) {
    %c0_i32 = arith.constant 0 : i32
    %c0_i32_0 = arith.constant 0 : i32
    %c0_i32_1 = arith.constant 0 : i32
    return %c0_i32, %c0_i32_0 : i32, i32
  }
  func.func @transform_7(%arg0: i32) -> (i32, i32) {
    %c0_i32 = arith.constant 0 : i32
    %c0_i32_0 = arith.constant 0 : i32
    return %arg0, %c0_i32 : i32, i32
  }
}

</mosaic_0001>

<bundles_post_ra>
// kernel: discriminator_forward.1
= control target key start
LH: loop header
LB: loop body
LE: loop exit
PB: predicated region body
PF: predicated region fallthrough
CT: control target
= control target key end

     0   :  { %12 = vsyncpa [#allocation3], 0  ;;  %s4104_s0 = inlined_call_operand.vmem [shape: bf16[8,512], index: 0, kind: input, shape index: {}]   ;;  %s4105_s1 = inlined_call_operand.hbm [shape: bf16[512,512], index: 1, kind: input, shape index: {}]   ;;  %s4106_s2 = inlined_call_operand.vmem [shape: f32[1,512], index: 2, kind: input, shape index: {}]   ;;  %s4107_s3 = inlined_call_operand.hbm [shape: bf16[512,512], index: 3, kind: input, shape index: {}]   ;;  %s4108_s4 = inlined_call_operand.vmem [shape: f32[1,512], index: 4, kind: input, shape index: {}]   ;;  %s4109_s5 = inlined_call_operand.hbm [shape: bf16[512,128], index: 5, kind: input, shape index: {}]   ;;  %s4110_s6 = inlined_call_operand.vmem [shape: f32[1,128], index: 6, kind: input, shape index: {}]   ;;  %s4111_s7 = inlined_call_operand.vmem [shape: f32[8,128], index: 7, kind: output, shape index: {}]  }
   0x1   :  { %13 = vsyncpa [#allocation5], 0  ;;  %s35_s26 = sshll.u32 %s4107_s3, 4  ;;  %s3952_s27 = smov [#allocation4]   ;;  %s36_s26 = int_to_ptr.hbm [resolvable:$true] %s35_s26 }
   0x2   :  { %s37_s28 = sshll.u32 %s3952_s27, 4  ;;  %s20_s8 = sshll.u32 %s4105_s1, 4  ;;  %s38_s28 = int_to_ptr.vmem [resolvable:$true] %s37_s28  ;;  %s21_s8 = int_to_ptr.hbm [resolvable:$true] %s20_s8 }
   0x3   :  { %s3953_s9 = smov 256   ;;  %s3954_s10 = smov 16  }
   0x4   :  { %43 = dma.hbm_to_vmem [thread:$0]  %s36_s26, 16384, %s38_s28, [#allocation5], %s3953_s9, %s3953_s9, %s3954_s10  }
   0x5   :  { %s3955_s11 = smov [#allocation2]   ;;  %s50_s15 = sshll.u32 %s4109_s5, 4  ;;  %s51_s15 = int_to_ptr.hbm [resolvable:$true] %s50_s15 }
   0x6   :  { %s22_s12 = sshll.u32 %s3955_s11, 4  ;;  %s3956_s3 = smov [#allocation6]   ;;  %s23_s12 = int_to_ptr.vmem [resolvable:$true] %s22_s12 }
   0x7   :  { %28 = dma.hbm_to_vmem [thread:$0]  %s21_s8, 16384, %s23_s12, [#allocation3], %s3953_s9, %s3953_s9, %s3954_s10  }
   0x8   :  { %s52_s16 = sshll.u32 %s3956_s3, 4  ;;  %s3957_s17 = smov 64   ;;  %s53_s16 = int_to_ptr.vmem [resolvable:$true] %s52_s16 }
   0x9   :  { %s3958_s18 = smov 4  }
   0xa   :  { %58 = dma.hbm_to_vmem [thread:$0]  %s51_s15, 4096, %s53_s16, [#allocation5], %s3957_s17, %s3957_s17, %s3958_s18  }
   0xb   :  { %3948 = dma.done.wait [#allocation3], 16384  }
   0xc   :  { %3949 = vsyncadd [#allocation3], 4294950912 }
   0xd   :  { %3950 = dma.done.wait [#allocation5], 20480  }
   0xe   :  { %3951 = vsyncadd [#allocation5], 4294946816  ;;  %v2537_v0 = vld [vmem:[#allocation2 + $0xe0] sm:$0xf]  ;;  %v3606_v1 = vld [vmem:[#allocation2 + $0xec] sm:$0xf0] }
   0xf   :  { %v2665_v2 = vld [vmem:[#allocation2 + $0x1e0] sm:$0xf]  ;;  %v2538_v3 = vor.u32 %v3606_v1, %v2537_v0  ;;  %v3638_v4 = vld [vmem:[#allocation2 + $0x1ec] sm:$0xf0] }
  0x10   :  { %v2793_v5 = vld [vmem:[#allocation2 + $0x2e0] sm:$0xf]  ;;  %v3670_v6 = vld [vmem:[#allocation2 + $0x2ec] sm:$0xf0]  ;;  %v2666_v7 = vor.u32 %v3638_v4, %v2665_v2 }
  0x11   :  { %v2794_v8 = vor.u32 %v3670_v6, %v2793_v5  ;;  %v2921_v9 = vld [vmem:[#allocation2 + $0x3e0] sm:$0xf]  ;;  %v3702_v10 = vld [vmem:[#allocation2 + $0x3ec] sm:$0xf0]  ;;  %867 = vmatpush.bf16.msra.mxu0 %v2538_v3 }
  0x12   :  { %v2521_v11 = vld [vmem:[#allocation2 + $0xc0] sm:$0xf]  ;;  %v2922_v12 = vor.u32 %v3702_v10, %v2921_v9  ;;  %v3602_v13 = vld [vmem:[#allocation2 + $0xcc] sm:$0xf0]  ;;  %880 = vmatpush.bf16.msra.mxu1 %v2666_v7 }
  0x13   :  { %v2649_v14 = vld [vmem:[#allocation2 + $0x1c0] sm:$0xf]  ;;  %v3634_v15 = vld [vmem:[#allocation2 + $0x1cc] sm:$0xf0]  ;;  %893 = vmatpush.bf16.msra.mxu2 %v2794_v8  ;;  %v2522_v16 = vor.u32 %v3602_v13, %v2521_v11 }
  0x14   :  { %v2650_v17 = vor.u32 %v3634_v15, %v2649_v14  ;;  %v2777_v18 = vld [vmem:[#allocation2 + $0x2c0] sm:$0xf]  ;;  %v3666_v19 = vld [vmem:[#allocation2 + $0x2cc] sm:$0xf0]  ;;  %906 = vmatpush.bf16.msra.mxu3 %v2922_v12 }
  0x15   :  { %v2905_v20 = vld [vmem:[#allocation2 + $0x3c0] sm:$0xf]  ;;  %v2778_v21 = vor.u32 %v3666_v19, %v2777_v18  ;;  %v3698_v22 = vld [vmem:[#allocation2 + $0x3cc] sm:$0xf0]  ;;  %868 = vmatpush.bf16.msra.mxu0 %v2522_v16 }
  0x16   :  { %v2505_v23 = vld [vmem:[#allocation2 + $0xa0] sm:$0xf]  ;;  %v3598_v24 = vld [vmem:[#allocation2 + $0xac] sm:$0xf0]  ;;  %v2906_v25 = vor.u32 %v3698_v22, %v2905_v20  ;;  %881 = vmatpush.bf16.msra.mxu1 %v2650_v17 }
  0x17   :  { %v2633_v26 = vld [vmem:[#allocation2 + $0x1a0] sm:$0xf]  ;;  %v3630_v27 = vld [vmem:[#allocation2 + $0x1ac] sm:$0xf0]  ;;  %v2506_v29 = vor.u32 %v3598_v24, %v2505_v23  ;;  %894 = vmatpush.bf16.msra.mxu2 %v2778_v21 }
  0x18   :  { %v2761_v28 = vld [vmem:[#allocation2 + $0x2a0] sm:$0xf]  ;;  %v3662_v30 = vld [vmem:[#allocation2 + $0x2ac] sm:$0xf0]  ;;  %v2634_v33 = vor.u32 %v3630_v27, %v2633_v26  ;;  %907 = vmatpush.bf16.msra.mxu3 %v2906_v25  ;;  %v74_v25 = vld [vmem:[%s4104_s0 + $0x8] sm:$0xff] }
  0x19   :  { %v2889_v31 = vld [vmem:[#allocation2 + $0x3a0] sm:$0xf]  ;;  %v3694_v32 = vld [vmem:[#allocation2 + $0x3ac] sm:$0xf0]  ;;  %v2762_v34 = vor.u32 %v3662_v30, %v2761_v28  ;;  %869 = vmatpush.bf16.msra.mxu0 %v2506_v29  ;;  %v3604_v30 = vld [vmem:[#allocation2 + $0xe4] sm:$0xf] }
  0x1a   :  { %v2489_v35 = vld [vmem:[#allocation2 + $0x80] sm:$0xf]  ;;  %v3594_v36 = vld [vmem:[#allocation2 + $0x8c] sm:$0xf0]  ;;  %v2890_v38 = vor.u32 %v3694_v32, %v2889_v31  ;;  %882 = vmatpush.bf16.msra.mxu1 %v2634_v33  ;;  %v2539_v31 = vld [vmem:[#allocation2 + $0xf0] sm:$0xf0] }
  0x1b   :  { %v2617_v37 = vld [vmem:[#allocation2 + $0x180] sm:$0xf]  ;;  %v3626_v39 = vld [vmem:[#allocation2 + $0x18c] sm:$0xf0]  ;;  %v2490_v44 = vor.u32 %v3594_v36, %v2489_v35  ;;  %895 = vmatpush.bf16.msra.mxu2 %v2762_v34  ;;  %v3636_v32 = vld [vmem:[#allocation2 + $0x1e4] sm:$0xf] }
  0x1c   :  { %v2745_v40 = vld [vmem:[#allocation2 + $0x280] sm:$0xf]  ;;  %v3658_v41 = vld [vmem:[#allocation2 + $0x28c] sm:$0xf0]  ;;  %v2618_v45 = vor.u32 %v3626_v39, %v2617_v37  ;;  %908 = vmatpush.bf16.msra.mxu3 %v2890_v38  ;;  %v2667_v34 = vld [vmem:[#allocation2 + $0x1f0] sm:$0xf0]  ;;  %v217_v37 = vunpack.c.l.b16 %v74_v25 }
  0x1d   :  { %v2873_v42 = vld [vmem:[#allocation2 + $0x380] sm:$0xf]  ;;  %v3690_v43 = vld [vmem:[#allocation2 + $0x38c] sm:$0xf0]  ;;  %v2746_v46 = vor.u32 %v3658_v41, %v2745_v40  ;;  %870 = vmatpush.bf16.msra.mxu0 %v2490_v44  ;;  %v3668_v35 = vld [vmem:[#allocation2 + $0x2e4] sm:$0xf] }
  0x1e   :  { %v2473_v47 = vld [vmem:[#allocation2 + $0x60] sm:$0xf]  ;;  %v3590_v48 = vld [vmem:[#allocation2 + $0x6c] sm:$0xf0]  ;;  %v2874_v50 = vor.u32 %v3690_v43, %v2873_v42  ;;  %883 = vmatpush.bf16.msra.mxu1 %v2618_v45  ;;  %v2795_v36 = vld [vmem:[#allocation2 + $0x2f0] sm:$0xf0]  ;;  %v218_v43 = vunpack.c.h.b16 %v74_v25  ;;  %v2542_v45 = vor.u32 %v3604_v30, %v2539_v31 }
  0x1f   :  { %v2601_v49 = vld [vmem:[#allocation2 + $0x160] sm:$0xf]  ;;  %v3622_v51 = vld [vmem:[#allocation2 + $0x16c] sm:$0xf0]  ;;  %v2474_v56 = vor.u32 %v3590_v48, %v2473_v47  ;;  %896 = vmatpush.bf16.msra.mxu2 %v2746_v46  ;;  %v3700_v40 = vld [vmem:[#allocation2 + $0x3e4] sm:$0xf]  ;;  %v2670_v47 = vor.u32 %v3636_v32, %v2667_v34  ;;  %v2798_v48 = vor.u32 %v3668_v35, %v2795_v36 }
  0x20   :  { %v2729_v52 = vld [vmem:[#allocation2 + $0x260] sm:$0xf]  ;;  %v3654_v53 = vld [vmem:[#allocation2 + $0x26c] sm:$0xf0]  ;;  %v2602_v57 = vor.u32 %v3622_v51, %v2601_v49  ;;  %909 = vmatpush.bf16.msra.mxu3 %v2874_v50  ;;  %v2923_v41 = vld [vmem:[#allocation2 + $0x3f0] sm:$0xf0] }
  0x21   :  { %v2857_v54 = vld [vmem:[#allocation2 + $0x360] sm:$0xf]  ;;  %v3686_v55 = vld [vmem:[#allocation2 + $0x36c] sm:$0xf0]  ;;  %v2730_v58 = vor.u32 %v3654_v53, %v2729_v52  ;;  %871 = vmatpush.bf16.msra.mxu0 %v2474_v56  ;;  %v3600_v49 = vld [vmem:[#allocation2 + $0xc4] sm:$0xf]  ;;  %v2926_v52 = vor.u32 %v3700_v40, %v2923_v41  ;;  %v4014_v53 = vpack.c.b16 %v217_v37, %v217_v37 }
  0x22   :  { %v2457_v59 = vld [vmem:[#allocation2 + $0x40] sm:$0xf]  ;;  %v3586_v60 = vld [vmem:[#allocation2 + $0x4c] sm:$0xf0]  ;;  %v2858_v62 = vor.u32 %v3686_v55, %v2857_v54  ;;  %884 = vmatpush.bf16.msra.mxu1 %v2602_v57  ;;  %v2523_v50 = vld [vmem:[#allocation2 + $0xd0] sm:$0xf0] }
  0x23   :  { %v2585_v61 = vld [vmem:[#allocation2 + $0x140] sm:$0xf]  ;;  %v3618_v63 = vld [vmem:[#allocation2 + $0x14c] sm:$0xf0]  ;;  %v2458_v4 = vor.u32 %v3586_v60, %v2457_v59  ;;  %897 = vmatpush.bf16.msra.mxu2 %v2730_v58  ;;  %v3632_v51 = vld [vmem:[#allocation2 + $0x1c4] sm:$0xf]  ;;  %v4018_v58 = vpack.c.b16 %v218_v43, %v218_v43 }
  0x24   :  { %v2713_v0 = vld [vmem:[#allocation2 + $0x240] sm:$0xf]  ;;  %v3650_v1 = vld [vmem:[#allocation2 + $0x24c] sm:$0xf0]  ;;  %v2586_v5 = vor.u32 %v3618_v63, %v2585_v61  ;;  %910 = vmatpush.bf16.msra.mxu3 %v2858_v62  ;;  %v2651_v54 = vld [vmem:[#allocation2 + $0x1d0] sm:$0xf0]  ;;  %v2526_v61 = vor.u32 %v3600_v49, %v2523_v50 }
  0x25   :  { %v2841_v2 = vld [vmem:[#allocation2 + $0x340] sm:$0xf]  ;;  %v3682_v3 = vld [vmem:[#allocation2 + $0x34c] sm:$0xf0]  ;;  %v2714_v6 = vor.u32 %v3650_v1, %v2713_v0  ;;  %872 = vmatpush.bf16.msra.mxu0 %v2458_v4  ;;  %v3664_v55 = vld [vmem:[#allocation2 + $0x2c4] sm:$0xf]  ;;  %v2654_v63 = vor.u32 %v3632_v51, %v2651_v54 }
  0x26   :  { %v2441_v7 = vld [vmem:[#allocation2 + $0x20] sm:$0xf]  ;;  %v3582_v8 = vld [vmem:[#allocation2 + $0x2c] sm:$0xf0]  ;;  %v2842_v10 = vor.u32 %v3682_v3, %v2841_v2  ;;  %885 = vmatpush.bf16.msra.mxu1 %v2586_v5  ;;  %v2779_v56 = vld [vmem:[#allocation2 + $0x2d0] sm:$0xf0] }
  0x27   :  { %v2569_v9 = vld [vmem:[#allocation2 + $0x120] sm:$0xf]  ;;  %v3614_v11 = vld [vmem:[#allocation2 + $0x12c] sm:$0xf0]  ;;  %v2442_v17 = vor.u32 %v3582_v8, %v2441_v7  ;;  %898 = vmatpush.bf16.msra.mxu2 %v2714_v6  ;;  %v3696_v59 = vld [vmem:[#allocation2 + $0x3c4] sm:$0xf]  ;;  %v2782_v0 = vor.u32 %v3664_v55, %v2779_v56 }
  0x28   :  { %v2697_v12 = vld [vmem:[#allocation2 + $0x220] sm:$0xf]  ;;  %v3646_v13 = vld [vmem:[#allocation2 + $0x22c] sm:$0xf0]  ;;  %v2570_v21 = vor.u32 %v3614_v11, %v2569_v9  ;;  %911 = vmatpush.bf16.msra.mxu3 %v2842_v10  ;;  %v2907_v60 = vld [vmem:[#allocation2 + $0x3d0] sm:$0xf0] }
  0x29   :  { %v2825_v14 = vld [vmem:[#allocation2 + $0x320] sm:$0xf]  ;;  %v3678_v15 = vld [vmem:[#allocation2 + $0x32c] sm:$0xf0]  ;;  %v2698_v22 = vor.u32 %v3646_v13, %v2697_v12  ;;  %873 = vmatpush.bf16.msra.mxu0 %v2442_v17  ;;  %v3596_v1 = vld [vmem:[#allocation2 + $0xa4] sm:$0xf]  ;;  %v2910_v4 = vor.u32 %v3696_v59, %v2907_v60 }
  0x2a   :  { %v2425_v16 = vld [vmem:[#allocation2] sm:$0xf]  ;;  %v3578_v18 = vld [vmem:[#allocation2 + $0xc] sm:$0xf0]  ;;  %v2826_v26 = vor.u32 %v3678_v15, %v2825_v14  ;;  %886 = vmatpush.bf16.msra.mxu1 %v2570_v21  ;;  %v2507_v2 = vld [vmem:[#allocation2 + $0xb0] sm:$0xf0] }
  0x2b   :  { %v2553_v19 = vld [vmem:[#allocation2 + $0x100] sm:$0xf]  ;;  %v3610_v20 = vld [vmem:[#allocation2 + $0x10c] sm:$0xf0]  ;;  %v2426_v33 = vor.u32 %v3578_v18, %v2425_v16  ;;  %899 = vmatpush.bf16.msra.mxu2 %v2698_v22  ;;  %v3628_v3 = vld [vmem:[#allocation2 + $0x1a4] sm:$0xf]  ;;  %v2510_v10 = vor.u32 %v3596_v1, %v2507_v2 }
  0x2c   :  { %v2681_v23 = vld [vmem:[#allocation2 + $0x200] sm:$0xf]  ;;  %v3642_v24 = vld [vmem:[#allocation2 + $0x20c] sm:$0xf0]  ;;  %v2554_v38 = vor.u32 %v3610_v20, %v2553_v19  ;;  %912 = vmatpush.bf16.msra.mxu3 %v2826_v26  ;;  %v2635_v5 = vld [vmem:[#allocation2 + $0x1b0] sm:$0xf0] }
  0x2d   :  { %v2809_v27 = vld [vmem:[#allocation2 + $0x300] sm:$0xf]  ;;  %v3674_v28 = vld [vmem:[#allocation2 + $0x30c] sm:$0xf0]  ;;  %v2682_v39 = vor.u32 %v3642_v24, %v2681_v23  ;;  %874 = vmatpush.bf16.msra.mxu0 %v2426_v33  ;;  %v3660_v6 = vld [vmem:[#allocation2 + $0x2a4] sm:$0xf]  ;;  %v2638_v11 = vor.u32 %v3628_v3, %v2635_v5 }
  0x2e   :  { %v73_v29 = vld [vmem:[%s4104_s0] sm:$0xff]  ;;  %v2810_v44 = vor.u32 %v3674_v28, %v2809_v27  ;;  %887 = vmatpush.bf16.msra.mxu1 %v2554_v38  ;;  %v2763_v7 = vld [vmem:[#allocation2 + $0x2b0] sm:$0xf0] }
  0x2f   :  { %v215_v42 = vunpack.c.l.b16 %v73_v29  ;;  %v216_v46 = vunpack.c.h.b16 %v73_v29  ;;  %900 = vmatpush.bf16.msra.mxu2 %v2682_v39  ;;  %v3692_v8 = vld [vmem:[#allocation2 + $0x3a4] sm:$0xf]  ;;  %v2891_v9 = vld [vmem:[#allocation2 + $0x3b0] sm:$0xf0]  ;;  %v2766_v12 = vor.u32 %v3660_v6, %v2763_v7 }
  0x30   :  { %913 = vmatpush.bf16.msra.mxu3 %v2810_v44  ;;  %v3592_v13 = vld [vmem:[#allocation2 + $0x84] sm:$0xf]  ;;  %v2491_v14 = vld [vmem:[#allocation2 + $0x90] sm:$0xf0]  ;;  %v2894_v16 = vor.u32 %v3692_v8, %v2891_v9 }
  0x31   :  { %v4016_v57 = vpack.c.b16 %v215_v42, %v215_v42  ;;  %919 = vmatpush.bf16.msrb.mxu0 %v2542_v45  ;;  %v4020_v62 = vpack.c.b16 %v216_v46, %v216_v46  ;;  %v3624_v15 = vld [vmem:[#allocation2 + $0x184] sm:$0xf]  ;;  %v2619_v17 = vld [vmem:[#allocation2 + $0x190] sm:$0xf0]  ;;  %v2494_v22 = vor.u32 %v3592_v13, %v2491_v14  ;;  %v3639_v14 = vld [vmem:[#allocation2 + $0x1f4] sm:$0xf0] }
  0x32   :  { %932 = vmatpush.bf16.msrb.mxu1 %v2670_v47  ;;  %901 = vmatmul.bf16.vlgmr.msra.gmra.mxu2 %v4014_v53  ;;  %v3656_v18 = vld [vmem:[#allocation2 + $0x284] sm:$0xf]  ;;  %v2747_v19 = vld [vmem:[#allocation2 + $0x290] sm:$0xf0]  ;;  %v2622_v23 = vor.u32 %v3624_v15, %v2619_v17  ;;  %v2801_v15 = vld [vmem:[#allocation2 + $0x2e8] sm:$0xf] }
  0x33   :  { %945 = vmatpush.bf16.msrb.mxu2 %v2798_v48  ;;  %875 = vmatmul.bf16.vlgmr.msra.gmra.mxu0 %v4016_v57  ;;  %v3688_v20 = vld [vmem:[#allocation2 + $0x384] sm:$0xf]  ;;  %v2875_v21 = vld [vmem:[#allocation2 + $0x390] sm:$0xf0]  ;;  %v2750_v24 = vor.u32 %v3656_v18, %v2747_v19  ;;  %v2929_v19 = vld [vmem:[#allocation2 + $0x3e8] sm:$0xf] }
  0x34   :  { %958 = vmatpush.bf16.msrb.mxu3 %v2926_v52  ;;  %888 = vmatmul.bf16.vlgmr.msra.gmra.mxu1 %v4020_v62  ;;  %v3588_v25 = vld [vmem:[#allocation2 + $0x64] sm:$0xf]  ;;  %v2475_v26 = vld [vmem:[#allocation2 + $0x70] sm:$0xf0]  ;;  %v2878_v28 = vor.u32 %v3688_v20, %v2875_v21  ;;  %v3703_v20 = vld [vmem:[#allocation2 + $0x3f4] sm:$0xf0] }
  0x35   :  { %914 = vmatmul.bf16.vlgmr.msra.gmra.mxu3 %v4018_v58  ;;  %920 = vmatpush.bf16.msrb.mxu0 %v2526_v61  ;;  %v3620_v27 = vld [vmem:[#allocation2 + $0x164] sm:$0xf]  ;;  %v2603_v29 = vld [vmem:[#allocation2 + $0x170] sm:$0xf0]  ;;  %v2478_v34 = vor.u32 %v3588_v25, %v2475_v26  ;;  %v2529_v25 = vld [vmem:[#allocation2 + $0xc8] sm:$0xf] }
  0x36   :  { %933 = vmatpush.bf16.msrb.mxu1 %v2654_v63  ;;  %v3652_v30 = vld [vmem:[#allocation2 + $0x264] sm:$0xf]  ;;  %v2731_v31 = vld [vmem:[#allocation2 + $0x270] sm:$0xf0]  ;;  %v2606_v35 = vor.u32 %v3620_v27, %v2603_v29  ;;  %v3603_v26 = vld [vmem:[#allocation2 + $0xd4] sm:$0xf0] }
  0x37   :  { %946 = vmatpush.bf16.msrb.mxu2 %v2782_v0  ;;  %v3684_v32 = vld [vmem:[#allocation2 + $0x364] sm:$0xf]  ;;  %v2859_v33 = vld [vmem:[#allocation2 + $0x370] sm:$0xf0]  ;;  %v2734_v36 = vor.u32 %v3652_v30, %v2731_v31  ;;  %v2657_v27 = vld [vmem:[#allocation2 + $0x1c8] sm:$0xf] }
  0x38   :  { %959 = vmatpush.bf16.msrb.mxu3 %v2910_v4  ;;  %v3584_v37 = vld [vmem:[#allocation2 + $0x44] sm:$0xf]  ;;  %v2459_v38 = vld [vmem:[#allocation2 + $0x50] sm:$0xf0]  ;;  %v2862_v40 = vor.u32 %v3684_v32, %v2859_v33  ;;  %v3635_v29 = vld [vmem:[#allocation2 + $0x1d4] sm:$0xf0] }
  0x39   :  { %921 = vmatpush.bf16.msrb.mxu0 %v2510_v10  ;;  %v3616_v39 = vld [vmem:[#allocation2 + $0x144] sm:$0xf]  ;;  %v2587_v41 = vld [vmem:[#allocation2 + $0x150] sm:$0xf0]  ;;  %v2462_v46 = vor.u32 %v3584_v37, %v2459_v38  ;;  %v2545_v10 = vld [vmem:[#allocation2 + $0xe8] sm:$0xf] }
  0x3a   :  { %934 = vmatpush.bf16.msrb.mxu1 %v2638_v11  ;;  %v3648_v42 = vld [vmem:[#allocation2 + $0x244] sm:$0xf]  ;;  %v2715_v43 = vld [vmem:[#allocation2 + $0x250] sm:$0xf0]  ;;  %v2590_v47 = vor.u32 %v3616_v39, %v2587_v41  ;;  %v3607_v11 = vld [vmem:[#allocation2 + $0xf4] sm:$0xf0] }
  0x3b   :  { %947 = vmatpush.bf16.msrb.mxu2 %v2766_v12  ;;  %v3680_v44 = vld [vmem:[#allocation2 + $0x344] sm:$0xf]  ;;  %v2843_v45 = vld [vmem:[#allocation2 + $0x350] sm:$0xf0]  ;;  %v2718_v48 = vor.u32 %v3648_v42, %v2715_v43  ;;  %v2673_v12 = vld [vmem:[#allocation2 + $0x1e8] sm:$0xf] }
  0x3c   :  { %960 = vmatpush.bf16.msrb.mxu3 %v2894_v16  ;;  %v3580_v49 = vld [vmem:[#allocation2 + $0x24] sm:$0xf]  ;;  %v2443_v50 = vld [vmem:[#allocation2 + $0x30] sm:$0xf0]  ;;  %v2846_v52 = vor.u32 %v3680_v44, %v2843_v45  ;;  %v3671_v16 = vld [vmem:[#allocation2 + $0x2f4] sm:$0xf0] }
  0x3d   :  { %922 = vmatpush.bf16.msrb.mxu0 %v2494_v22  ;;  %v3612_v51 = vld [vmem:[#allocation2 + $0x124] sm:$0xf]  ;;  %v2571_v54 = vld [vmem:[#allocation2 + $0x130] sm:$0xf0]  ;;  %v2446_v61 = vor.u32 %v3580_v49, %v2443_v50  ;;  %v2546_v22 = vor.u32 %v3607_v11, %v2545_v10  ;;  %v2785_v30 = vld [vmem:[#allocation2 + $0x2c8] sm:$0xf] }
  0x3e   :  { %935 = vmatpush.bf16.msrb.mxu1 %v2622_v23  ;;  %v3644_v55 = vld [vmem:[#allocation2 + $0x224] sm:$0xf]  ;;  %v2699_v56 = vld [vmem:[#allocation2 + $0x230] sm:$0xf0]  ;;  %v2574_v1 = vor.u32 %v3612_v51, %v2571_v54  ;;  %v2674_v23 = vor.u32 %v3639_v14, %v2673_v12  ;;  %v3667_v31 = vld [vmem:[#allocation2 + $0x2d4] sm:$0xf0] }
  0x3f   :  { %948 = vmatpush.bf16.msrb.mxu2 %v2750_v24  ;;  %v3676_v59 = vld [vmem:[#allocation2 + $0x324] sm:$0xf]  ;;  %v2827_v60 = vld [vmem:[#allocation2 + $0x330] sm:$0xf0]  ;;  %v2702_v2 = vor.u32 %v3644_v55, %v2699_v56  ;;  %v2802_v24 = vor.u32 %v3671_v16, %v2801_v15  ;;  %v2913_v32 = vld [vmem:[#allocation2 + $0x3c8] sm:$0xf] }
  0x40   :  { %961 = vmatpush.bf16.msrb.mxu3 %v2878_v28  ;;  %v3576_v63 = vld [vmem:[#allocation2 + $0x4] sm:$0xf]  ;;  %v2427_v0 = vld [vmem:[#allocation2 + $0x10] sm:$0xf0]  ;;  %v2830_v6 = vor.u32 %v3676_v59, %v2827_v60  ;;  %v2930_v28 = vor.u32 %v3703_v20, %v2929_v19  ;;  %v3699_v33 = vld [vmem:[#allocation2 + $0x3d4] sm:$0xf0] }
  0x41   :  { %923 = vmatpush.bf16.msrb.mxu0 %v2478_v34  ;;  %v3608_v3 = vld [vmem:[#allocation2 + $0x104] sm:$0xf]  ;;  %v2555_v4 = vld [vmem:[#allocation2 + $0x110] sm:$0xf0]  ;;  %v2430_v13 = vor.u32 %v3576_v63, %v2427_v0  ;;  %v2530_v34 = vor.u32 %v3603_v26, %v2529_v25  ;;  %v2513_v37 = vld [vmem:[#allocation2 + $0xa8] sm:$0xf] }
  0x42   :  { %936 = vmatpush.bf16.msrb.mxu1 %v2606_v35  ;;  %v3640_v5 = vld [vmem:[#allocation2 + $0x204] sm:$0xf]  ;;  %v2683_v7 = vld [vmem:[#allocation2 + $0x210] sm:$0xf0]  ;;  %v2558_v17 = vor.u32 %v3608_v3, %v2555_v4  ;;  %v2658_v35 = vor.u32 %v3635_v29, %v2657_v27  ;;  %v3599_v38 = vld [vmem:[#allocation2 + $0xb4] sm:$0xf0] }
  0x43   :  { %949 = vmatpush.bf16.msrb.mxu2 %v2734_v36  ;;  %v3672_v8 = vld [vmem:[#allocation2 + $0x304] sm:$0xf]  ;;  %v2811_v9 = vld [vmem:[#allocation2 + $0x310] sm:$0xf0]  ;;  %v2686_v18 = vor.u32 %v3640_v5, %v2683_v7  ;;  %v2786_v36 = vor.u32 %v3667_v31, %v2785_v30  ;;  %v2641_v39 = vld [vmem:[#allocation2 + $0x1a8] sm:$0xf] }
  0x44   :  { %962 = vmatpush.bf16.msrb.mxu3 %v2862_v40  ;;  %v2814_v21 = vor.u32 %v3672_v8, %v2811_v9  ;;  %v2914_v40 = vor.u32 %v3699_v33, %v2913_v32  ;;  %v3631_v41 = vld [vmem:[#allocation2 + $0x1b4] sm:$0xf0]  ;;  %v2769_v42 = vld [vmem:[#allocation2 + $0x2a8] sm:$0xf] }
  0x45   :  { %924 = vmatpush.bf16.msrb.mxu0 %v2462_v46  ;;  %v3663_v43 = vld [vmem:[#allocation2 + $0x2b4] sm:$0xf0]  ;;  %v2897_v44 = vld [vmem:[#allocation2 + $0x3a8] sm:$0xf]  ;;  %v2514_v46 = vor.u32 %v3599_v38, %v2513_v37 }
  0x46   :  { %937 = vmatpush.bf16.msrb.mxu1 %v2590_v47  ;;  %v3695_v45 = vld [vmem:[#allocation2 + $0x3b4] sm:$0xf0]  ;;  %v2642_v47 = vor.u32 %v3631_v41, %v2641_v39  ;;  %v2497_v49 = vld [vmem:[#allocation2 + $0x88] sm:$0xf] }
  0x47   :  { %950 = vmatpush.bf16.msrb.mxu2 %v2718_v48  ;;  %v2770_v48 = vor.u32 %v3663_v43, %v2769_v42  ;;  %v3595_v50 = vld [vmem:[#allocation2 + $0x94] sm:$0xf0]  ;;  %v2625_v51 = vld [vmem:[#allocation2 + $0x188] sm:$0xf] }
  0x48   :  { %963 = vmatpush.bf16.msrb.mxu3 %v2846_v52  ;;  %v2898_v52 = vor.u32 %v3695_v45, %v2897_v44  ;;  %v3627_v54 = vld [vmem:[#allocation2 + $0x194] sm:$0xf0]  ;;  %v2753_v55 = vld [vmem:[#allocation2 + $0x288] sm:$0xf] }
  0x49   :  { %925 = vmatpush.bf16.msrb.mxu0 %v2446_v61  ;;  %v3659_v56 = vld [vmem:[#allocation2 + $0x294] sm:$0xf0]  ;;  %v2881_v59 = vld [vmem:[#allocation2 + $0x388] sm:$0xf]  ;;  %v2498_v61 = vor.u32 %v3595_v50, %v2497_v49  ;;  %v2626_v63 = vor.u32 %v3627_v54, %v2625_v51  ;;  %v2675_v50 = vld [vmem:[#allocation2 + $0x1f8] sm:$0xf0] }
  0x4a   :  { %938 = vmatpush.bf16.msrb.mxu1 %v2574_v1  ;;  %v3691_v60 = vld [vmem:[#allocation2 + $0x394] sm:$0xf0]  ;;  %v2754_v0 = vor.u32 %v3659_v56, %v2753_v55  ;;  %v2481_v1 = vld [vmem:[#allocation2 + $0x68] sm:$0xf]  ;;  %v3669_v51 = vld [vmem:[#allocation2 + $0x2ec] sm:$0xf] }
  0x4b   :  { %951 = vmatpush.bf16.msrb.mxu2 %v2702_v2  ;;  %v3591_v2 = vld [vmem:[#allocation2 + $0x74] sm:$0xf0]  ;;  %v2609_v3 = vld [vmem:[#allocation2 + $0x168] sm:$0xf]  ;;  %v2882_v4 = vor.u32 %v3691_v60, %v2881_v59  ;;  %v3701_v56 = vld [vmem:[#allocation2 + $0x3ec] sm:$0xf] }
  0x4c   :  { %964 = vmatpush.bf16.msrb.mxu3 %v2830_v6  ;;  %v3623_v5 = vld [vmem:[#allocation2 + $0x174] sm:$0xf0]  ;;  %v2737_v6 = vld [vmem:[#allocation2 + $0x268] sm:$0xf]  ;;  %v2482_v10 = vor.u32 %v3591_v2, %v2481_v1  ;;  %v2931_v59 = vld [vmem:[#allocation2 + $0x3f8] sm:$0xf0] }
  0x4d   :  { %926 = vmatpush.bf16.msrb.mxu0 %v2430_v13  ;;  %v3655_v7 = vld [vmem:[#allocation2 + $0x274] sm:$0xf0]  ;;  %v2865_v8 = vld [vmem:[#allocation2 + $0x368] sm:$0xf]  ;;  %v2610_v11 = vor.u32 %v3623_v5, %v2609_v3  ;;  %v3601_v1 = vld [vmem:[#allocation2 + $0xcc] sm:$0xf] }
  0x4e   :  { %939 = vmatpush.bf16.msrb.mxu1 %v2558_v17  ;;  %v3687_v9 = vld [vmem:[#allocation2 + $0x374] sm:$0xf0]  ;;  %v2738_v12 = vor.u32 %v3655_v7, %v2737_v6  ;;  %v2465_v13 = vld [vmem:[#allocation2 + $0x48] sm:$0xf]  ;;  %v2531_v2 = vld [vmem:[#allocation2 + $0xd8] sm:$0xf0] }
  0x4f   :  { %952 = vmatpush.bf16.msrb.mxu2 %v2686_v18  ;;  %v3587_v14 = vld [vmem:[#allocation2 + $0x54] sm:$0xf0]  ;;  %v2593_v15 = vld [vmem:[#allocation2 + $0x148] sm:$0xf]  ;;  %v2866_v16 = vor.u32 %v3687_v9, %v2865_v8  ;;  %v3633_v3 = vld [vmem:[#allocation2 + $0x1cc] sm:$0xf] }
  0x50   :  { %965 = vmatpush.bf16.msrb.mxu3 %v2814_v21  ;;  %927 = vmatmul.bf16.vlgmr.msrb.gmra.mxu0 %v4016_v57  ;;  %v3619_v17 = vld [vmem:[#allocation2 + $0x154] sm:$0xf0]  ;;  %v2721_v18 = vld [vmem:[#allocation2 + $0x248] sm:$0xf]  ;;  %v2659_v5 = vld [vmem:[#allocation2 + $0x1d8] sm:$0xf0] }
  0x51   :  { %971 = vmatpush.bf16.msra.mxu0 %v2546_v22  ;;  %940 = vmatmul.bf16.vlgmr.msrb.gmra.mxu1 %v4020_v62  ;;  %v3651_v19 = vld [vmem:[#allocation2 + $0x254] sm:$0xf0]  ;;  %v2849_v20 = vld [vmem:[#allocation2 + $0x348] sm:$0xf]  ;;  %v2466_v22 = vor.u32 %v3587_v14, %v2465_v13  ;;  %v3665_v6 = vld [vmem:[#allocation2 + $0x2cc] sm:$0xf] }
  0x52   :  { %984 = vmatpush.bf16.msra.mxu1 %v2674_v23  ;;  %953 = vmatmul.bf16.vlgmr.msrb.gmra.mxu2 %v4014_v53  ;;  %v3683_v21 = vld [vmem:[#allocation2 + $0x354] sm:$0xf0]  ;;  %v2594_v23 = vor.u32 %v3619_v17, %v2593_v15  ;;  %v2449_v25 = vld [vmem:[#allocation2 + $0x28] sm:$0xf]  ;;  %v2787_v7 = vld [vmem:[#allocation2 + $0x2d8] sm:$0xf0] }
  0x53   :  { %997 = vmatpush.bf16.msra.mxu2 %v2802_v24  ;;  %966 = vmatmul.bf16.vlgmr.msrb.gmra.mxu3 %v4018_v58  ;;  %v2722_v24 = vor.u32 %v3651_v19, %v2721_v18  ;;  %v3583_v26 = vld [vmem:[#allocation2 + $0x34] sm:$0xf0]  ;;  %v2577_v27 = vld [vmem:[#allocation2 + $0x128] sm:$0xf]  ;;  %v3697_v8 = vld [vmem:[#allocation2 + $0x3cc] sm:$0xf] }
  0x54   :  { %1010 = vmatpush.bf16.msra.mxu3 %v2930_v28  ;;  %v2850_v28 = vor.u32 %v3683_v21, %v2849_v20  ;;  %v3615_v29 = vld [vmem:[#allocation2 + $0x134] sm:$0xf0]  ;;  %v2705_v30 = vld [vmem:[#allocation2 + $0x228] sm:$0xf]  ;;  %v2915_v9 = vld [vmem:[#allocation2 + $0x3d8] sm:$0xf0] }
  0x55   :  { %972 = vmatpush.bf16.msra.mxu0 %v2530_v34  ;;  %v3647_v31 = vld [vmem:[#allocation2 + $0x234] sm:$0xf0]  ;;  %v2833_v32 = vld [vmem:[#allocation2 + $0x328] sm:$0xf]  ;;  %v2450_v34 = vor.u32 %v3583_v26, %v2449_v25  ;;  %v2578_v37 = vor.u32 %v3615_v29, %v2577_v27  ;;  %v3597_v13 = vld [vmem:[#allocation2 + $0xac] sm:$0xf] }
  0x56   :  { %985 = vmatpush.bf16.msra.mxu1 %v2658_v35  ;;  %v3679_v33 = vld [vmem:[#allocation2 + $0x334] sm:$0xf0]  ;;  %v2433_v35 = vld [vmem:[#allocation2 + $0x8] sm:$0xf]  ;;  %v2706_v38 = vor.u32 %v3647_v31, %v2705_v30  ;;  %v2515_v14 = vld [vmem:[#allocation2 + $0xb8] sm:$0xf0] }
  0x57   :  { %998 = vmatpush.bf16.msra.mxu2 %v2786_v36  ;;  %v3579_v36 = vld [vmem:[#allocation2 + $0x14] sm:$0xf0]  ;;  %v2561_v39 = vld [vmem:[#allocation2 + $0x108] sm:$0xf]  ;;  %v2834_v42 = vor.u32 %v3679_v33, %v2833_v32  ;;  %v3629_v15 = vld [vmem:[#allocation2 + $0x1ac] sm:$0xf] }
  0x58   :  { %1011 = vmatpush.bf16.msra.mxu3 %v2914_v40  ;;  %v3611_v40 = vld [vmem:[#allocation2 + $0x114] sm:$0xf0]  ;;  %v2689_v41 = vld [vmem:[#allocation2 + $0x208] sm:$0xf]  ;;  %v2434_v49 = vor.u32 %v3579_v36, %v2433_v35  ;;  %v2643_v17 = vld [vmem:[#allocation2 + $0x1b8] sm:$0xf0] }
  0x59   :  { %973 = vmatpush.bf16.msra.mxu0 %v2514_v46  ;;  %v3643_v43 = vld [vmem:[#allocation2 + $0x214] sm:$0xf0]  ;;  %v2817_v44 = vld [vmem:[#allocation2 + $0x308] sm:$0xf]  ;;  %v3605_v46 = vld [vmem:[#allocation2 + $0xec] sm:$0xf]  ;;  %v2562_v54 = vor.u32 %v3611_v40, %v2561_v39 }
  0x5a   :  { %986 = vmatpush.bf16.msra.mxu1 %v2642_v47  ;;  %v3675_v45 = vld [vmem:[#allocation2 + $0x314] sm:$0xf0]  ;;  %v2547_v47 = vld [vmem:[#allocation2 + $0xf8] sm:$0xf0]  ;;  %v2690_v55 = vor.u32 %v3643_v43, %v2689_v41  ;;  %v3661_v18 = vld [vmem:[#allocation2 + $0x2ac] sm:$0xf] }
  0x5b   :  { %999 = vmatpush.bf16.msra.mxu2 %v2770_v48  ;;  %v3637_v48 = vld [vmem:[#allocation2 + $0x1ec] sm:$0xf]  ;;  %v2818_v60 = vor.u32 %v3675_v45, %v2817_v44  ;;  %v2771_v19 = vld [vmem:[#allocation2 + $0x2b8] sm:$0xf0] }
  0x5c   :  { %1012 = vmatpush.bf16.msra.mxu3 %v2898_v52  ;;  %v2803_v52 = vld [vmem:[#allocation2 + $0x2f8] sm:$0xf0]  ;;  %v3693_v20 = vld [vmem:[#allocation2 + $0x3ac] sm:$0xf] }
  0x5d   :  { %974 = vmatpush.bf16.msra.mxu0 %v2498_v61  ;;  %v2550_v61 = vor.u32 %v3605_v46, %v2547_v47  ;;  %v2899_v21 = vld [vmem:[#allocation2 + $0x3b8] sm:$0xf0]  ;;  %v3593_v25 = vld [vmem:[#allocation2 + $0x8c] sm:$0xf] }
  0x5e   :  { %987 = vmatpush.bf16.msra.mxu1 %v2626_v63  ;;  %v2678_v63 = vor.u32 %v3637_v48, %v2675_v50  ;;  %v2499_v26 = vld [vmem:[#allocation2 + $0x98] sm:$0xf0]  ;;  %v3625_v27 = vld [vmem:[#allocation2 + $0x18c] sm:$0xf] }
  0x5f   :  { %1000 = vmatpush.bf16.msra.mxu2 %v2754_v0  ;;  %v2806_v0 = vor.u32 %v3669_v51, %v2803_v52  ;;  %v2627_v29 = vld [vmem:[#allocation2 + $0x198] sm:$0xf0]  ;;  %v3657_v30 = vld [vmem:[#allocation2 + $0x28c] sm:$0xf] }
  0x60   :  { %1013 = vmatpush.bf16.msra.mxu3 %v2882_v4  ;;  %v2934_v4 = vor.u32 %v3701_v56, %v2931_v59  ;;  %v2755_v31 = vld [vmem:[#allocation2 + $0x298] sm:$0xf0]  ;;  %v3689_v32 = vld [vmem:[#allocation2 + $0x38c] sm:$0xf]  ;;  %v2630_v35 = vor.u32 %v3625_v27, %v2627_v29 }
  0x61   :  { %975 = vmatpush.bf16.msra.mxu0 %v2482_v10  ;;  %v2534_v10 = vor.u32 %v3601_v1, %v2531_v2  ;;  %v2883_v33 = vld [vmem:[#allocation2 + $0x398] sm:$0xf0]  ;;  %v2758_v36 = vor.u32 %v3657_v30, %v2755_v31  ;;  %v3621_v39 = vld [vmem:[#allocation2 + $0x16c] sm:$0xf]  ;;  %v3033_v31 = vld [vmem:[#allocation4 + $0xc0] sm:$0xf] }
  0x62   :  { %988 = vmatpush.bf16.msra.mxu1 %v2610_v11  ;;  %v2662_v11 = vor.u32 %v3633_v3, %v2659_v5  ;;  %v2886_v40 = vor.u32 %v3689_v32, %v2883_v33  ;;  %v2611_v41 = vld [vmem:[#allocation2 + $0x178] sm:$0xf0]  ;;  %v3685_v44 = vld [vmem:[#allocation2 + $0x36c] sm:$0xf]  ;;  %v3730_v32 = vld [vmem:[#allocation4 + $0xcc] sm:$0xf0] }
  0x63   :  { %1001 = vmatpush.bf16.msra.mxu2 %v2738_v12  ;;  %v2790_v12 = vor.u32 %v3665_v6, %v2787_v7  ;;  %v2739_v43 = vld [vmem:[#allocation2 + $0x278] sm:$0xf0]  ;;  %v2614_v47 = vor.u32 %v3621_v39, %v2611_v41  ;;  %v3617_v51 = vld [vmem:[#allocation2 + $0x14c] sm:$0xf]  ;;  %v3758_v41 = vld [vmem:[#allocation4 + $0x1ac] sm:$0xf0] }
  0x64   :  { %1014 = vmatpush.bf16.msra.mxu3 %v2866_v16  ;;  %v2918_v16 = vor.u32 %v3697_v8, %v2915_v9  ;;  %v2867_v45 = vld [vmem:[#allocation2 + $0x378] sm:$0xf0]  ;;  %v3681_v59 = vld [vmem:[#allocation2 + $0x34c] sm:$0xf] }
  0x65   :  { %976 = vmatpush.bf16.msra.mxu0 %v2466_v22  ;;  %v2518_v22 = vor.u32 %v3597_v13, %v2515_v14  ;;  %v2467_v50 = vld [vmem:[#allocation2 + $0x58] sm:$0xf0]  ;;  %v2870_v52 = vor.u32 %v3685_v44, %v2867_v45  ;;  %v3581_v1 = vld [vmem:[#allocation2 + $0x2c] sm:$0xf]  ;;  %v3722_v44 = vld [vmem:[#allocation4 + $0x8c] sm:$0xf0] }
  0x66   :  { %989 = vmatpush.bf16.msra.mxu1 %v2594_v23  ;;  %v2646_v23 = vor.u32 %v3629_v15, %v2643_v17  ;;  %v2723_v56 = vld [vmem:[#allocation2 + $0x258] sm:$0xf0]  ;;  %v3613_v3 = vld [vmem:[#allocation2 + $0x12c] sm:$0xf] }
  0x67   :  { %1002 = vmatpush.bf16.msra.mxu2 %v2722_v24  ;;  %v2774_v24 = vor.u32 %v3661_v18, %v2771_v19  ;;  %v2451_v2 = vld [vmem:[#allocation2 + $0x38] sm:$0xf0]  ;;  %v3645_v6 = vld [vmem:[#allocation2 + $0x22c] sm:$0xf] }
  0x68   :  { %1015 = vmatpush.bf16.msra.mxu3 %v2850_v28  ;;  %v2902_v28 = vor.u32 %v3693_v20, %v2899_v21  ;;  %v2579_v5 = vld [vmem:[#allocation2 + $0x138] sm:$0xf0]  ;;  %v3677_v8 = vld [vmem:[#allocation2 + $0x32c] sm:$0xf] }
  0x69   :  { %977 = vmatpush.bf16.msra.mxu0 %v2450_v34  ;;  %v2502_v34 = vor.u32 %v3593_v25, %v2499_v26  ;;  %v2707_v7 = vld [vmem:[#allocation2 + $0x238] sm:$0xf0]  ;;  %v3609_v15 = vld [vmem:[#allocation2 + $0x10c] sm:$0xf]  ;;  %v3177_v25 = vld [vmem:[#allocation4 + $0x1e0] sm:$0xf] }
  0x6a   :  { %990 = vmatpush.bf16.msra.mxu1 %v2578_v37  ;;  %v3589_v37 = vld [vmem:[#allocation2 + $0x6c] sm:$0xf]  ;;  %v2835_v9 = vld [vmem:[#allocation2 + $0x338] sm:$0xf0]  ;;  %v2710_v13 = vor.u32 %v3645_v6, %v2707_v7  ;;  %v3766_v26 = vld [vmem:[#allocation4 + $0x1ec] sm:$0xf0] }
  0x6b   :  { %1003 = vmatpush.bf16.msra.mxu2 %v2706_v38  ;;  %v2483_v38 = vld [vmem:[#allocation2 + $0x78] sm:$0xf0]  ;;  %v2838_v17 = vor.u32 %v3677_v8, %v2835_v9  ;;  %v3641_v18 = vld [vmem:[#allocation2 + $0x20c] sm:$0xf]  ;;  %v3178_v33 = vor.u32 %v3766_v26, %v3177_v25  ;;  %v3051_v6 = vld [vmem:[#allocation4 + $0xf0] sm:$0xf0] }
  0x6c   :  { %1016 = vmatpush.bf16.msra.mxu3 %v2834_v42  ;;  %v3653_v42 = vld [vmem:[#allocation2 + $0x26c] sm:$0xf]  ;;  %v2486_v46 = vor.u32 %v3589_v37, %v2483_v38  ;;  %v2435_v14 = vld [vmem:[#allocation2 + $0x18] sm:$0xf0]  ;;  %v3017_v37 = vld [vmem:[#allocation4 + $0xa0] sm:$0xf] }
  0x6d   :  { %978 = vmatpush.bf16.msra.mxu0 %v2434_v49  ;;  %v2742_v48 = vor.u32 %v3653_v42, %v2739_v43  ;;  %v3585_v49 = vld [vmem:[#allocation2 + $0x4c] sm:$0xf]  ;;  %v2691_v19 = vld [vmem:[#allocation2 + $0x218] sm:$0xf0]  ;;  %v3726_v38 = vld [vmem:[#allocation4 + $0xac] sm:$0xf0] }
  0x6e   :  { %991 = vmatpush.bf16.msra.mxu1 %v2562_v54  ;;  %v2595_v54 = vld [vmem:[#allocation2 + $0x158] sm:$0xf0]  ;;  %v3673_v20 = vld [vmem:[#allocation2 + $0x30c] sm:$0xf]  ;;  %v3018_v42 = vor.u32 %v3726_v38, %v3017_v37  ;;  %v3001_v43 = vld [vmem:[#allocation4 + $0x80] sm:$0xf] }
  0x6f   :  { %1004 = vmatpush.bf16.msra.mxu2 %v2690_v55  ;;  %v3649_v55 = vld [vmem:[#allocation2 + $0x24c] sm:$0xf]  ;;  %v2819_v21 = vld [vmem:[#allocation2 + $0x318] sm:$0xf0]  ;;  %v3065_v8 = vld [vmem:[#allocation4 + $0x100] sm:$0xf] }
  0x70   :  { %1017 = vmatpush.bf16.msra.mxu3 %v2818_v60  ;;  %979 = vmatmul.bf16.vlgmr.msra.gmra.mxu0 %v4016_v57  ;;  %v2851_v60 = vld [vmem:[#allocation2 + $0x358] sm:$0xf0]  ;;  %v2822_v29 = vor.u32 %v3673_v20, %v2819_v21  ;;  %v3738_v9 = vld [vmem:[#allocation4 + $0x10c] sm:$0xf0]  ;;  %v3289_v21 = vld [vmem:[#allocation4 + $0x2c0] sm:$0xf] }
  0x71   :  { %1023 = vmatpush.bf16.msrb.mxu0 %v2550_v61  ;;  %992 = vmatmul.bf16.vlgmr.msra.gmra.mxu1 %v4020_v62  ;;  %v2470_v61 = vor.u32 %v3585_v49, %v2467_v50  ;;  %v3718_v49 = vld [vmem:[#allocation4 + $0x6c] sm:$0xf0]  ;;  %v3113_v50 = vld [vmem:[#allocation4 + $0x160] sm:$0xf]  ;;  %v3163_v25 = vld [vmem:[#allocation4 + $0x1d0] sm:$0xf0] }
  0x72   :  { %1036 = vmatpush.bf16.msrb.mxu1 %v2678_v63  ;;  %1005 = vmatmul.bf16.vlgmr.msra.gmra.mxu2 %v4014_v53  ;;  %v2598_v63 = vor.u32 %v3617_v51, %v2595_v54  ;;  %v3720_v37 = vld [vmem:[#allocation4 + $0x84] sm:$0xf]  ;;  %v3003_v38 = vld [vmem:[#allocation4 + $0x90] sm:$0xf0] }
  0x73   :  { %1049 = vmatpush.bf16.msrb.mxu2 %v2806_v0  ;;  %1018 = vmatmul.bf16.vlgmr.msra.gmra.mxu3 %v4018_v58  ;;  %v2726_v0 = vor.u32 %v3649_v55, %v2723_v56  ;;  %v3097_v55 = vld [vmem:[#allocation4 + $0x140] sm:$0xf]  ;;  %v3746_v56 = vld [vmem:[#allocation4 + $0x14c] sm:$0xf0] }
  0x74   :  { %1062 = vmatpush.bf16.msrb.mxu3 %v2934_v4  ;;  %v2854_v4 = vor.u32 %v3681_v59, %v2851_v60  ;;  %v2953_v60 = vld [vmem:[#allocation4 + $0x20] sm:$0xf] }
  0x75   :  { %1024 = vmatpush.bf16.msrb.mxu0 %v2534_v10  ;;  %v2454_v10 = vor.u32 %v3581_v1, %v2451_v2  ;;  %v3742_v1 = vld [vmem:[#allocation4 + $0x12c] sm:$0xf0] }
  0x76   :  { %1037 = vmatpush.bf16.msrb.mxu1 %v2662_v11  ;;  %v3577_v11 = vld [vmem:[#allocation2 + $0xc] sm:$0xf] }
  0x77   :  { %1050 = vmatpush.bf16.msrb.mxu2 %v2790_v12  ;;  %v2582_v12 = vor.u32 %v3613_v3, %v2579_v5  ;;  %v2937_v3 = vld [vmem:[#allocation4] sm:$0xf]  ;;  %v3732_v5 = vld [vmem:[#allocation4 + $0xe4] sm:$0xf] }
  0x78   :  { %1063 = vmatpush.bf16.msrb.mxu3 %v2918_v16  ;;  %v2563_v16 = vld [vmem:[#allocation2 + $0x118] sm:$0xf0] }
  0x79   :  { %1025 = vmatpush.bf16.msrb.mxu0 %v2518_v22  ;;  %v3049_v22 = vld [vmem:[#allocation4 + $0xe0] sm:$0xf]  ;;  %v2566_v27 = vor.u32 %v3609_v15, %v2563_v16  ;;  %v3054_v16 = vor.u32 %v3732_v5, %v3051_v6  ;;  %v3099_v6 = vld [vmem:[#allocation4 + $0x150] sm:$0xf0] }
  0x7a   :  { %1038 = vmatpush.bf16.msrb.mxu1 %v2646_v23  ;;  %v3734_v23 = vld [vmem:[#allocation4 + $0xec] sm:$0xf0] }
  0x7b   :  { %1051 = vmatpush.bf16.msrb.mxu2 %v2774_v24  ;;  %v2438_v24 = vor.u32 %v3577_v11, %v2435_v14  ;;  %v3050_v30 = vor.u32 %v3734_v23, %v3049_v22  ;;  %v3798_v11 = vld [vmem:[#allocation4 + $0x2ec] sm:$0xf0]  ;;  %v3179_v14 = vld [vmem:[#allocation4 + $0x1f0] sm:$0xf0] }
  0x7c   :  { %1064 = vmatpush.bf16.msrb.mxu3 %v2902_v28  ;;  %v2694_v28 = vor.u32 %v3641_v18, %v2691_v19  ;;  %v3066_v18 = vor.u32 %v3738_v9, %v3065_v8  ;;  %v3035_v19 = vld [vmem:[#allocation4 + $0xd0] sm:$0xf0]  ;;  %v3794_v22 = vld [vmem:[#allocation4 + $0x2cc] sm:$0xf0]  ;;  %v3708_v9 = vld [vmem:[#allocation4 + $0x24] sm:$0xf] }
  0x7d   :  { %1026 = vmatpush.bf16.msrb.mxu0 %v2502_v34  ;;  %v3161_v34 = vld [vmem:[#allocation4 + $0x1c0] sm:$0xf]  ;;  %v3290_v23 = vor.u32 %v3794_v22, %v3289_v21  ;;  %v3704_v21 = vld [vmem:[#allocation4 + $0x4] sm:$0xf]  ;;  %v2939_v22 = vld [vmem:[#allocation4 + $0x10] sm:$0xf0] }
  0x7e   :  { %1039 = vmatpush.bf16.msrb.mxu1 %v2630_v35  ;;  %v3762_v35 = vld [vmem:[#allocation4 + $0x1cc] sm:$0xf0] }
  0x7f   :  { %1052 = vmatpush.bf16.msrb.mxu2 %v2758_v36  ;;  %v3034_v36 = vor.u32 %v3730_v32, %v3033_v31  ;;  %v3162_v39 = vor.u32 %v3762_v35, %v3161_v34  ;;  %v3790_v31 = vld [vmem:[#allocation4 + $0x2ac] sm:$0xf0]  ;;  %v3147_v34 = vld [vmem:[#allocation4 + $0x1b0] sm:$0xf0]  ;;  %v4041_v35 = vld [vmem:[%s4106_s2] sm:$0xf] }
  0x80   :  { %1065 = vmatpush.bf16.msrb.mxu3 %v2886_v40  ;;  %v3145_v40 = vld [vmem:[#allocation4 + $0x1a0] sm:$0xf] }
  0x81   :  { %1027 = vmatpush.bf16.msrb.mxu0 %v2486_v46  ;;  %v3146_v45 = vor.u32 %v3758_v41, %v3145_v40  ;;  %v3129_v46 = vld [vmem:[#allocation4 + $0x180] sm:$0xf]  ;;  %v3786_v41 = vld [vmem:[#allocation4 + $0x28c] sm:$0xf0] }
  0x82   :  { %1040 = vmatpush.bf16.msrb.mxu1 %v2614_v47  ;;  %v3002_v47 = vor.u32 %v3722_v44, %v3001_v43  ;;  %v3257_v40 = vld [vmem:[#allocation4 + $0x280] sm:$0xf]  ;;  %v3752_v44 = vld [vmem:[#allocation4 + $0x184] sm:$0xf] }
  0x83   :  { %1053 = vmatpush.bf16.msrb.mxu2 %v2742_v48  ;;  %v2985_v48 = vld [vmem:[#allocation4 + $0x60] sm:$0xf]  ;;  %v3258_v43 = vor.u32 %v3786_v41, %v3257_v40  ;;  %v3307_v41 = vld [vmem:[#allocation4 + $0x2f0] sm:$0xf0] }
  0x84   :  { %1066 = vmatpush.bf16.msrb.mxu3 %v2870_v52  ;;  %v2986_v51 = vor.u32 %v3718_v49, %v2985_v48  ;;  %v2969_v52 = vld [vmem:[#allocation4 + $0x40] sm:$0xf]  ;;  %v2987_v48 = vld [vmem:[#allocation4 + $0x70] sm:$0xf0] }
  0x85   :  { %1028 = vmatpush.bf16.msrb.mxu0 %v2470_v61  ;;  %v3710_v61 = vld [vmem:[#allocation4 + $0x2c] sm:$0xf0] }
  0x86   :  { %1041 = vmatpush.bf16.msrb.mxu1 %v2598_v63  ;;  %v3098_v63 = vor.u32 %v3746_v56, %v3097_v55  ;;  %v2954_v2 = vor.u32 %v3710_v61, %v2953_v60  ;;  %v2971_v60 = vld [vmem:[#allocation4 + $0x50] sm:$0xf0] }
  0x87   :  { %1054 = vmatpush.bf16.msrb.mxu2 %v2726_v0  ;;  %v3081_v0 = vld [vmem:[#allocation4 + $0x120] sm:$0xf] }
  0x88   :  { %1067 = vmatpush.bf16.msrb.mxu3 %v2854_v4  ;;  %v3706_v4 = vld [vmem:[#allocation4 + $0xc] sm:$0xf0]  ;;  %v3082_v7 = vor.u32 %v3742_v1, %v3081_v0  ;;  %v3225_v0 = vld [vmem:[#allocation4 + $0x240] sm:$0xf] }
  0x89   :  { %1029 = vmatpush.bf16.msrb.mxu0 %v2454_v10  ;;  %v3305_v10 = vld [vmem:[#allocation4 + $0x2e0] sm:$0xf]  ;;  %v2938_v15 = vor.u32 %v3706_v4, %v2937_v3  ;;  %v3778_v1 = vld [vmem:[#allocation4 + $0x24c] sm:$0xf0] }
  0x8a   :  { %1042 = vmatpush.bf16.msrb.mxu1 %v2582_v12  ;;  %v3306_v12 = vor.u32 %v3798_v11, %v3305_v10  ;;  %v3226_v5 = vor.u32 %v3778_v1, %v3225_v0  ;;  %v2955_v10 = vld [vmem:[#allocation4 + $0x30] sm:$0xf0]  ;;  %v3723_v0 = vld [vmem:[#allocation4 + $0x94] sm:$0xf0]  ;;  %v3385_v1 = vld [vmem:[#allocation4 + $0x380] sm:$0xf] }
  0x8b   :  { %1055 = vmatpush.bf16.msrb.mxu2 %v2710_v13  ;;  %v3764_v13 = vld [vmem:[#allocation4 + $0x1e4] sm:$0xf] }
  0x8c   :  { %1068 = vmatpush.bf16.msrb.mxu3 %v2838_v17  ;;  %v3728_v17 = vld [vmem:[#allocation4 + $0xc4] sm:$0xf]  ;;  %v3182_v20 = vor.u32 %v3764_v13, %v3179_v14  ;;  %v3209_v14 = vld [vmem:[#allocation4 + $0x220] sm:$0xf] }
  0x8d   :  { %1030 = vmatpush.bf16.msrb.mxu0 %v2438_v24  ;;  %v3760_v24 = vld [vmem:[#allocation4 + $0x1c4] sm:$0xf]  ;;  %v3038_v26 = vor.u32 %v3728_v17, %v3035_v19  ;;  %v3083_v19 = vld [vmem:[#allocation4 + $0x130] sm:$0xf0] }
  0x8e   :  { %1043 = vmatpush.bf16.msrb.mxu1 %v2566_v27  ;;  %v3724_v27 = vld [vmem:[#allocation4 + $0xa4] sm:$0xf] }
  0x8f   :  { %1056 = vmatpush.bf16.msrb.mxu2 %v2694_v28  ;;  %v3019_v28 = vld [vmem:[#allocation4 + $0xb0] sm:$0xf0] }
  0x90   :  { %1069 = vmatpush.bf16.msrb.mxu3 %v2822_v29  ;;  %1031 = vmatmul.bf16.vlgmr.msrb.gmra.mxu0 %v4016_v57  ;;  %v3754_v57 = vld [vmem:[#allocation4 + $0x18c] sm:$0xf0]  ;;  %v3166_v29 = vor.u32 %v3760_v24, %v3163_v25  ;;  %v3057_v24 = vld [vmem:[#allocation4 + $0xe8] sm:$0xf] }
  0x91   :  { %1865 = vmatpush.bf16.msra.mxu0 %v3050_v30  ;;  %1044 = vmatmul.bf16.vlgmr.msrb.gmra.mxu1 %v4020_v62  ;;  %v3130_v62 = vor.u32 %v3754_v57, %v3129_v46  ;;  %v3273_v30 = vld [vmem:[#allocation4 + $0x2a0] sm:$0xf]  ;;  %v3006_v46 = vor.u32 %v3720_v37, %v3003_v38  ;;  %v3830_v37 = vld [vmem:[#allocation4 + $0x3ec] sm:$0xf0]  ;;  %v3796_v38 = vld [vmem:[#allocation4 + $0x2e4] sm:$0xf] }
  0x92   :  { %1878 = vmatpush.bf16.msra.mxu1 %v3178_v33  ;;  %1057 = vmatmul.bf16.vlgmr.msrb.gmra.mxu2 %v4014_v53  ;;  %v3750_v53 = vld [vmem:[#allocation4 + $0x16c] sm:$0xf0]  ;;  %v3274_v32 = vor.u32 %v3790_v31, %v3273_v30  ;;  %v3756_v33 = vld [vmem:[#allocation4 + $0x1a4] sm:$0xf] }
  0x93   :  { %1070 = vmatmul.bf16.vlgmr.msrb.gmra.mxu3 %v4018_v58  ;;  %v3714_v58 = vld [vmem:[#allocation4 + $0x4c] sm:$0xf0]  ;;  %v3114_v54 = vor.u32 %v3750_v53, %v3113_v50  ;;  %1891 = vmatpush.bf16.msra.mxu2 %v3306_v12  ;;  %v3241_v53 = vld [vmem:[#allocation4 + $0x260] sm:$0xf]  ;;  %v3736_v31 = vld [vmem:[#allocation4 + $0x104] sm:$0xf] }
  0x94   :  { %v2970_v59 = vor.u32 %v3714_v58, %v2969_v52  ;;  %v3748_v52 = vld [vmem:[#allocation4 + $0x164] sm:$0xf] }
  0x95   :  { %1866 = vmatpush.bf16.msra.mxu0 %v3034_v36  ;;  %v3022_v36 = vor.u32 %v3724_v27, %v3019_v28  ;;  %v3770_v27 = vld [vmem:[#allocation4 + $0x20c] sm:$0xf0]  ;;  %v3735_v28 = vld [vmem:[#allocation4 + $0xf4] sm:$0xf0] }
  0x96   :  { %1879 = vmatpush.bf16.msra.mxu1 %v3162_v39  ;;  %v3150_v39 = vor.u32 %v3756_v33, %v3147_v34 }
  0x97   :  { %1892 = vmatpush.bf16.msra.mxu2 %v3290_v23 }
  0x99   :  { %1867 = vmatpush.bf16.msra.mxu0 %v3018_v42  ;;  %v205_v42 = vperm.slane %v4041_v35, 0 }
  0x9a   :  { %1880 = vmatpush.bf16.msra.mxu1 %v3146_v45  ;;  %v3131_v45 = vld [vmem:[#allocation4 + $0x190] sm:$0xf0] }
  0x9b   :  { %1893 = vmatpush.bf16.msra.mxu2 %v3274_v32  ;;  %v3134_v49 = vor.u32 %v3752_v44, %v3131_v45  ;;  %v3067_v32 = vld [vmem:[#allocation4 + $0x110] sm:$0xf0]  ;;  %v3310_v44 = vor.u32 %v3796_v38, %v3307_v41  ;;  %v3041_v45 = vld [vmem:[#allocation4 + $0xc8] sm:$0xf]  ;;  %v3806_v41 = vld [vmem:[#allocation4 + $0x32c] sm:$0xf0] }
  0x9d   :  { %1868 = vmatpush.bf16.msra.mxu0 %v3002_v47  ;;  %v3716_v47 = vld [vmem:[#allocation4 + $0x64] sm:$0xf] }
  0x9e   :  { %1881 = vmatpush.bf16.msra.mxu1 %v3130_v62  ;;  %v2990_v56 = vor.u32 %v3716_v47, %v2987_v48  ;;  %v3826_v47 = vld [vmem:[#allocation4 + $0x3cc] sm:$0xf0]  ;;  %v3792_v48 = vld [vmem:[#allocation4 + $0x2c4] sm:$0xf] }
  0x9f   :  { %1894 = vmatpush.bf16.msra.mxu2 %v3258_v43  ;;  %v3070_v43 = vor.u32 %v3736_v31, %v3067_v32 }
  0xa1   :  { %1869 = vmatpush.bf16.msra.mxu0 %v2986_v51  ;;  %v3782_v51 = vld [vmem:[#allocation4 + $0x26c] sm:$0xf0] }
  0xa2   :  { %1882 = vmatpush.bf16.msra.mxu1 %v3114_v54  ;;  %v3242_v58 = vor.u32 %v3782_v51, %v3241_v53  ;;  %v3115_v54 = vld [vmem:[#allocation4 + $0x170] sm:$0xf0]  ;;  %v3025_v53 = vld [vmem:[#allocation4 + $0xa8] sm:$0xf]  ;;  %v3727_v51 = vld [vmem:[#allocation4 + $0xb4] sm:$0xf0] }
  0xa3   :  { %v3118_v61 = vor.u32 %v3748_v52, %v3115_v54  ;;  %v3822_v54 = vld [vmem:[#allocation4 + $0x3ac] sm:$0xf0] }
  0xa4   :  { %1895 = vmatpush.bf16.msra.mxu2 %v3242_v58  ;;  %v3401_v58 = vld [vmem:[#allocation4 + $0x3a0] sm:$0xf] }
  0xa5   :  { %1870 = vmatpush.bf16.msra.mxu0 %v2970_v59  ;;  %v3712_v59 = vld [vmem:[#allocation4 + $0x44] sm:$0xf] }
  0xa6   :  { %1883 = vmatpush.bf16.msra.mxu1 %v3098_v63 }
  0xa8   :  { %1896 = vmatpush.bf16.msra.mxu2 %v3226_v5  ;;  %v3259_v5 = vld [vmem:[#allocation4 + $0x290] sm:$0xf0] }
  0xa9   :  { %1871 = vmatpush.bf16.msra.mxu0 %v2954_v2  ;;  %v3744_v2 = vld [vmem:[#allocation4 + $0x144] sm:$0xf] }
  0xaa   :  { %1884 = vmatpush.bf16.msra.mxu1 %v3082_v7  ;;  %v2974_v7 = vor.u32 %v3712_v59, %v2971_v60  ;;  %v3102_v12 = vor.u32 %v3744_v2, %v3099_v6  ;;  %v3275_v59 = vld [vmem:[#allocation4 + $0x2b0] sm:$0xf0]  ;;  %v3818_v2 = vld [vmem:[#allocation4 + $0x38c] sm:$0xf0]  ;;  %v206_v6 = vperm.slane %v4041_v35, 1 }
  0xad   :  { %1872 = vmatpush.bf16.msra.mxu0 %v2938_v15  ;;  %v3774_v15 = vld [vmem:[#allocation4 + $0x22c] sm:$0xf0] }
  0xae   :  { %1885 = vmatpush.bf16.msra.mxu1 %v3066_v18  ;;  %v3210_v18 = vor.u32 %v3774_v15, %v3209_v14  ;;  %v3780_v14 = vld [vmem:[#allocation4 + $0x264] sm:$0xf] }
  0xb0   :  { %v876_v57 = vpop.f32.mrf.mxu0  ;;  %1897 = vmatpush.bf16.msra.mxu2 %v3210_v18  ;;  %v3243_v18 = vld [vmem:[#allocation4 + $0x270] sm:$0xf0] }
  0xb1   :  { %1917 = vmatpush.bf16.msrb.mxu0 %v3054_v16  ;;  %v877_v62 = vadd.f32 %v876_v57, %v205_v42  ;;  %v889_v50 = vpop.f32.mrf.mxu1  ;;  %v3740_v16 = vld [vmem:[#allocation4 + $0x124] sm:$0xf]  ;;  %v3058_v42 = vor.u32 %v3735_v28, %v3057_v24  ;;  %v3417_v57 = vld [vmem:[#allocation4 + $0x3c0] sm:$0xf] }
  0xb2   :  { %1930 = vmatpush.bf16.msrb.mxu1 %v3182_v20  ;;  %v2958_v20 = vor.u32 %v3708_v9, %v2955_v10  ;;  %v3086_v25 = vor.u32 %v3740_v16, %v3083_v19  ;;  %v2993_v9 = vld [vmem:[#allocation4 + $0x68] sm:$0xf]  ;;  %v3719_v10 = vld [vmem:[#allocation4 + $0x74] sm:$0xf0]  ;;  %v3353_v24 = vld [vmem:[#allocation4 + $0x340] sm:$0xf] }
  0xb3   :  { %v890_v55 = vadd.f32 %v889_v50, %v877_v62  ;;  %v3291_v62 = vld [vmem:[#allocation4 + $0x2d0] sm:$0xf0]  ;;  %v2994_v19 = vor.u32 %v3719_v10, %v2993_v9  ;;  %v3729_v9 = vld [vmem:[#allocation4 + $0xcc] sm:$0xf]  ;;  %v3043_v10 = vld [vmem:[#allocation4 + $0xd8] sm:$0xf0] }
  0xb4   :  { %v3294_v52 = vor.u32 %v3792_v48, %v3291_v62  ;;  %v3185_v48 = vld [vmem:[#allocation4 + $0x1e8] sm:$0xf] }
  0xb5   :  { %1918 = vmatpush.bf16.msrb.mxu0 %v3038_v26  ;;  %v902_v63 = vpop.f32.mrf.mxu2  ;;  %v3193_v26 = vld [vmem:[#allocation4 + $0x200] sm:$0xf] }
  0xb6   :  { %1931 = vmatpush.bf16.msrb.mxu1 %v3166_v29  ;;  %v903_v3 = vadd.f32 %v902_v63, %v890_v55  ;;  %v3194_v30 = vor.u32 %v3770_v27, %v3193_v26  ;;  %v3788_v55 = vld [vmem:[#allocation4 + $0x2a4] sm:$0xf]  ;;  %v3009_v63 = vld [vmem:[#allocation4 + $0x88] sm:$0xf] }
  0xb7   :  { %v3278_v60 = vor.u32 %v3788_v55, %v3275_v59  ;;  %v3776_v26 = vld [vmem:[#allocation4 + $0x244] sm:$0xf]  ;;  %v3169_v59 = vld [vmem:[#allocation4 + $0x1c8] sm:$0xf] }
  0xb8   :  { %v915_v4 = vpop.f32.mrf.mxu3  ;;  %v878_v11 = vpop.f32.mrf.mxu0  ;;  %1898 = vmatpush.bf16.msra.mxu2 %v3194_v30  ;;  %v3768_v55 = vld [vmem:[#allocation4 + $0x204] sm:$0xf] }
  0xb9   :  { %1919 = vmatpush.bf16.msrb.mxu0 %v3022_v36  ;;  %v916_v8 = vadd.f32 %v915_v4, %v903_v3  ;;  %v891_v13 = vpop.f32.mrf.mxu1  ;;  %v3433_v36 = vld [vmem:[#allocation4 + $0x3e0] sm:$0xf]  ;;  %v3784_v3 = vld [vmem:[#allocation4 + $0x284] sm:$0xf]  ;;  %v3386_v4 = vor.u32 %v3818_v2, %v3385_v1  ;;  %v3763_v2 = vld [vmem:[#allocation4 + $0x1d4] sm:$0xf0] }
  0xba   :  { %1932 = vmatpush.bf16.msrb.mxu1 %v3150_v39  ;;  %v2942_v39 = vor.u32 %v3704_v21, %v2939_v22  ;;  %v3434_v40 = vor.u32 %v3830_v37, %v3433_v36  ;;  %v3814_v13 = vld [vmem:[#allocation4 + $0x36c] sm:$0xf0]  ;;  %v2977_v22 = vld [vmem:[#allocation4 + $0x48] sm:$0xf]  ;;  %v3711_v37 = vld [vmem:[#allocation4 + $0x34] sm:$0xf0] }
  0xbb   :  { %v1075_v17 = vmul.f32 0.01, %v916_v8  ;;  %v2961_v36 = vld [vmem:[#allocation4 + $0x28] sm:$0xf] }
  0xbc   :  { %1904 = vmatpush.bf16.msra.mxu3 %v3434_v40  ;;  %1943 = vmatpush.bf16.msrb.mxu2 %v3310_v44  ;;  %v3337_v40 = vld [vmem:[#allocation4 + $0x320] sm:$0xf] }
  0xbd   :  { %1920 = vmatpush.bf16.msrb.mxu0 %v3006_v46  ;;  %v1079_v23 = vmax.f32 %v916_v8, %v1075_v17  ;;  %v904_v29 = vpop.f32.mrf.mxu2  ;;  %v3731_v46 = vld [vmem:[#allocation4 + $0xd4] sm:$0xf0]  ;;  %v3010_v8 = vor.u32 %v3723_v0, %v3009_v63  ;;  %v3195_v63 = vld [vmem:[#allocation4 + $0x210] sm:$0xf0] }
  0xbe   :  { %1933 = vmatpush.bf16.msrb.mxu1 %v3134_v49  ;;  %v3418_v49 = vor.u32 %v3826_v47, %v3417_v57  ;;  %v3042_v50 = vor.u32 %v3731_v46, %v3041_v45  ;;  %v3227_v29 = vld [vmem:[#allocation4 + $0x250] sm:$0xf0]  ;;  %v3338_v45 = vor.u32 %v3806_v41, %v3337_v40  ;;  %v2962_v47 = vor.u32 %v3711_v37, %v2961_v36  ;;  %v2995_v40 = vld [vmem:[#allocation4 + $0x78] sm:$0xf0] }
  0xbf   :  { %v4044_v33 = vpack.c.bf16 %v1079_v23, %v1079_v23  ;;  %v3715_v23 = vld [vmem:[#allocation4 + $0x54] sm:$0xf0]  ;;  %v3211_v46 = vld [vmem:[#allocation4 + $0x230] sm:$0xf0] }
  0xc0   :  { %v917_v34 = vpop.f32.mrf.mxu3  ;;  %1905 = vmatpush.bf16.msra.mxu3 %v3418_v49  ;;  %1944 = vmatpush.bf16.msrb.mxu2 %v3294_v52  ;;  %v2978_v32 = vor.u32 %v3715_v23, %v2977_v22  ;;  %v3767_v49 = vld [vmem:[#allocation4 + $0x1f4] sm:$0xf0]  ;;  %v3137_v23 = vld [vmem:[#allocation4 + $0x188] sm:$0xf] }
  0xc1   :  { %1921 = vmatpush.bf16.msrb.mxu0 %v2990_v56  ;;  %v3402_v56 = vor.u32 %v3822_v54, %v3401_v58  ;;  %v3230_v34 = vor.u32 %v3776_v26, %v3227_v29  ;;  %v3321_v58 = vld [vmem:[#allocation4 + $0x300] sm:$0xf]  ;;  %v3802_v54 = vld [vmem:[#allocation4 + $0x30c] sm:$0xf0] }
  0xc2   :  { %1934 = vmatpush.bf16.msrb.mxu1 %v3118_v61  ;;  %1873 = vmatmul.bf16.vlgmr.msra.gmra.mxu0 %v4044_v33  ;;  %v3026_v61 = vor.u32 %v3727_v51, %v3025_v53  ;;  %v3733_v53 = vld [vmem:[#allocation4 + $0xec] sm:$0xf]  ;;  %v3059_v51 = vld [vmem:[#allocation4 + $0xf8] sm:$0xf0] }
  0xc4   :  { %1906 = vmatpush.bf16.msra.mxu3 %v3402_v56  ;;  %1945 = vmatpush.bf16.msrb.mxu2 %v3278_v60  ;;  %v3186_v56 = vor.u32 %v3767_v49, %v3185_v48 }
  0xc5   :  { %1922 = vmatpush.bf16.msrb.mxu0 %v2974_v7  ;;  %v3262_v7 = vor.u32 %v3784_v3, %v3259_v5  ;;  %v3828_v5 = vld [vmem:[#allocation4 + $0x3e4] sm:$0xf] }
  0xc6   :  { %1935 = vmatpush.bf16.msrb.mxu1 %v3102_v12  ;;  %v3369_v12 = vld [vmem:[#allocation4 + $0x360] sm:$0xf] }
  0xc7   :  { %v3370_v17 = vor.u32 %v3814_v13, %v3369_v12  ;;  %v3824_v12 = vld [vmem:[#allocation4 + $0x3c4] sm:$0xf]  ;;  %v3419_v13 = vld [vmem:[#allocation4 + $0x3d0] sm:$0xf0] }
  0xc8   :  { %1907 = vmatpush.bf16.msra.mxu3 %v3386_v4  ;;  %1946 = vmatpush.bf16.msrb.mxu2 %v3262_v7  ;;  %v3198_v4 = vor.u32 %v3768_v55, %v3195_v63  ;;  %v3062_v7 = vor.u32 %v3733_v53, %v3059_v51  ;;  %v3743_v55 = vld [vmem:[#allocation4 + $0x134] sm:$0xf0] }
  0xc9   :  { %1923 = vmatpush.bf16.msrb.mxu0 %v2958_v20  ;;  %v3246_v20 = vor.u32 %v3780_v14, %v3243_v18  ;;  %v3153_v14 = vld [vmem:[#allocation4 + $0x1a8] sm:$0xf]  ;;  %v3820_v18 = vld [vmem:[#allocation4 + $0x3a4] sm:$0xf] }
  0xca   :  { %1936 = vmatpush.bf16.msrb.mxu1 %v3086_v25  ;;  %v3810_v25 = vld [vmem:[#allocation4 + $0x34c] sm:$0xf0] }
  0xcb   :  { %v3354_v28 = vor.u32 %v3810_v25, %v3353_v24  ;;  %v3755_v24 = vld [vmem:[#allocation4 + $0x194] sm:$0xf0] }
  0xcc   :  { %1908 = vmatpush.bf16.msra.mxu3 %v3370_v17  ;;  %1947 = vmatpush.bf16.msrb.mxu2 %v3246_v20  ;;  %v3046_v17 = vor.u32 %v3729_v9, %v3043_v10  ;;  %v3725_v20 = vld [vmem:[#allocation4 + $0xac] sm:$0xf]  ;;  %v3138_v29 = vor.u32 %v3755_v24, %v3137_v23  ;;  %v3739_v9 = vld [vmem:[#allocation4 + $0x114] sm:$0xf0]  ;;  %v3313_v10 = vld [vmem:[#allocation4 + $0x2e8] sm:$0xf] }
  0xcd   :  { %1924 = vmatpush.bf16.msrb.mxu0 %v2942_v39  ;;  %v928_v11 = vpop.f32.mrf.mxu0 }
  0xce   :  { %1937 = vmatpush.bf16.msrb.mxu1 %v3070_v43  ;;  %v929_v15 = vadd.f32 %v928_v11, %v206_v6  ;;  %v941_v16 = vpop.f32.mrf.mxu1  ;;  %v2945_v43 = vld [vmem:[#allocation4 + $0x8] sm:$0xf]  ;;  %v3435_v6 = vld [vmem:[#allocation4 + $0x3f0] sm:$0xf0]  ;;  %v3170_v11 = vor.u32 %v3763_v2, %v3169_v59  ;;  %v2963_v2 = vld [vmem:[#allocation4 + $0x38] sm:$0xf0] }
  0xd0   :  { %v942_v21 = vadd.f32 %v941_v16, %v929_v15  ;;  %1909 = vmatpush.bf16.msra.mxu3 %v3354_v28  ;;  %1948 = vmatpush.bf16.msrb.mxu2 %v3230_v34  ;;  %v3759_v15 = vld [vmem:[#allocation4 + $0x1b4] sm:$0xf0]  ;;  %v3422_v16 = vor.u32 %v3824_v12, %v3419_v13  ;;  %v3011_v28 = vld [vmem:[#allocation4 + $0x98] sm:$0xf0] }
  0xd1   :  { %1969 = vmatpush.bf16.msra.mxu0 %v3058_v42  ;;  %v3772_v42 = vld [vmem:[#allocation4 + $0x224] sm:$0xf]  ;;  %v3154_v22 = vor.u32 %v3759_v15, %v3153_v14  ;;  %v3751_v34 = vld [vmem:[#allocation4 + $0x174] sm:$0xf0]  ;;  %v3765_v15 = vld [vmem:[#allocation4 + $0x1ec] sm:$0xf] }
  0xd2   :  { %1925 = vmatmul.bf16.vlgmr.msrb.gmra.mxu0 %v4044_v33  ;;  %v3214_v62 = vor.u32 %v3772_v42, %v3211_v46  ;;  %v3812_v42 = vld [vmem:[#allocation4 + $0x364] sm:$0xf]  ;;  %v3747_v46 = vld [vmem:[#allocation4 + $0x154] sm:$0xf0] }
  0xd3   :  { %v3799_v14 = vld [vmem:[#allocation4 + $0x2f4] sm:$0xf0] }
  0xd4   :  { %1910 = vmatpush.bf16.msra.mxu3 %v3338_v45  ;;  %1949 = vmatpush.bf16.msrb.mxu2 %v3214_v62  ;;  %v3105_v45 = vld [vmem:[#allocation4 + $0x148] sm:$0xf]  ;;  %v3713_v62 = vld [vmem:[#allocation4 + $0x4c] sm:$0xf] }
  0xd5   :  { %1970 = vmatpush.bf16.msra.mxu0 %v3042_v50  ;;  %v954_v27 = vpop.f32.mrf.mxu2  ;;  %v930_v39 = vpop.f32.mrf.mxu0  ;;  %v3707_v50 = vld [vmem:[#allocation4 + $0x14] sm:$0xf0]  ;;  %v3106_v51 = vor.u32 %v3747_v46, %v3105_v45  ;;  %v3753_v45 = vld [vmem:[#allocation4 + $0x18c] sm:$0xf]  ;;  %v3139_v46 = vld [vmem:[#allocation4 + $0x198] sm:$0xf0] }
  0xd6   :  { %v955_v30 = vadd.f32 %v954_v27, %v942_v21  ;;  %v967_v31 = vpop.f32.mrf.mxu3  ;;  %v943_v44 = vpop.f32.mrf.mxu1  ;;  %v2946_v1 = vor.u32 %v3707_v50, %v2945_v43  ;;  %v3027_v21 = vld [vmem:[#allocation4 + $0xb8] sm:$0xf0]  ;;  %v3721_v27 = vld [vmem:[#allocation4 + $0x8c] sm:$0xf]  ;;  %v3371_v43 = vld [vmem:[#allocation4 + $0x370] sm:$0xf0] }
  0xd7   :  { %v3030_v26 = vor.u32 %v3725_v20, %v3027_v21  ;;  %v3014_v37 = vor.u32 %v3721_v27, %v3011_v28  ;;  %v3717_v39 = vld [vmem:[#allocation4 + $0x6c] sm:$0xf]  ;;  %v2979_v50 = vld [vmem:[#allocation4 + $0x58] sm:$0xf0]  ;;  %v3800_v21 = vld [vmem:[#allocation4 + $0x304] sm:$0xf] }
  0xd8   :  { %v968_v38 = vadd.f32 %v967_v31, %v955_v30  ;;  %1950 = vmatpush.bf16.msrb.mxu2 %v3198_v4  ;;  %v3816_v30 = vld [vmem:[#allocation4 + $0x384] sm:$0xf]  ;;  %v3387_v31 = vld [vmem:[#allocation4 + $0x390] sm:$0xf0]  ;;  %v2998_v49 = vor.u32 %v3717_v39, %v2995_v40  ;;  %v3761_v28 = vld [vmem:[#allocation4 + $0x1cc] sm:$0xf] }
  0xd9   :  { %1971 = vmatpush.bf16.msra.mxu0 %v3026_v61  ;;  %v3322_v61 = vor.u32 %v3802_v54, %v3321_v58  ;;  %v3390_v36 = vor.u32 %v3816_v30, %v3387_v31  ;;  %v3355_v58 = vld [vmem:[#allocation4 + $0x350] sm:$0xf0]  ;;  %v3089_v54 = vld [vmem:[#allocation4 + $0x128] sm:$0xf]  ;;  %v3804_v4 = vld [vmem:[#allocation4 + $0x324] sm:$0xf] }
  0xda   :  { %v1076_v57 = vmul.f32 0.01, %v968_v38  ;;  %v3757_v39 = vld [vmem:[#allocation4 + $0x1ac] sm:$0xf]  ;;  %v3155_v40 = vld [vmem:[#allocation4 + $0x1b8] sm:$0xf0] }
  0xdb   :  { %1911 = vmatpush.bf16.msra.mxu3 %v3322_v61 }
  0xdc   :  { %v1080_v52 = vmax.f32 %v968_v38, %v1076_v57  ;;  %v207_v38 = vperm.slane %v4041_v35, 2  ;;  %v3374_v57 = vor.u32 %v3812_v42, %v3371_v43  ;;  %v3791_v42 = vld [vmem:[#allocation4 + $0x2b4] sm:$0xf0]  ;;  %v3158_v43 = vor.u32 %v3757_v39, %v3155_v40 }
  0xdd   :  { %1972 = vmatpush.bf16.msra.mxu0 %v3010_v8  ;;  %v956_v60 = vpop.f32.mrf.mxu2  ;;  %v3438_v8 = vor.u32 %v3828_v5, %v3435_v6  ;;  %v3339_v5 = vld [vmem:[#allocation4 + $0x330] sm:$0xf0] }
  0xde   :  { %v4049_v0 = vpack.c.bf16 %v1080_v52, %v1080_v52  ;;  %v969_v3 = vpop.f32.mrf.mxu3  ;;  %v3808_v52 = vld [vmem:[#allocation4 + $0x344] sm:$0xf]  ;;  %v2982_v60 = vor.u32 %v3713_v62, %v2979_v50  ;;  %v3749_v50 = vld [vmem:[#allocation4 + $0x16c] sm:$0xf] }
  0xdf   :  { %1956 = vmatpush.bf16.msrb.mxu3 %v3438_v8  ;;  %v3090_v3 = vor.u32 %v3743_v55, %v3089_v54  ;;  %v3073_v8 = vld [vmem:[#allocation4 + $0x108] sm:$0xf] }
  0xe0   :  { %1886 = vmatmul.bf16.vlgmr.msra.gmra.mxu1 %v4049_v0  ;;  %v3074_v20 = vor.u32 %v3739_v9, %v3073_v8 }
  0xe1   :  { %1973 = vmatpush.bf16.msra.mxu0 %v2994_v19  ;;  %1982 = vmatpush.bf16.msra.mxu1 %v3186_v56  ;;  %v3403_v19 = vld [vmem:[#allocation4 + $0x3b0] sm:$0xf0]  ;;  %v3358_v56 = vor.u32 %v3808_v52, %v3355_v58  ;;  %v3783_v52 = vld [vmem:[#allocation4 + $0x274] sm:$0xf0] }
  0xe2   :  { %v3406_v25 = vor.u32 %v3820_v18, %v3403_v19  ;;  %v3705_v18 = vld [vmem:[#allocation4 + $0xc] sm:$0xf]  ;;  %v2947_v19 = vld [vmem:[#allocation4 + $0x18] sm:$0xf0] }
  0xe3   :  { %1957 = vmatpush.bf16.msrb.mxu3 %v3422_v16  ;;  %v3187_v16 = vld [vmem:[#allocation4 + $0x1f8] sm:$0xf0] }
  0xe4   :  { %v3190_v24 = vor.u32 %v3765_v15, %v3187_v16  ;;  %v3075_v15 = vld [vmem:[#allocation4 + $0x118] sm:$0xf0] }
  0xe5   :  { %1974 = vmatpush.bf16.msra.mxu0 %v2978_v32  ;;  %1983 = vmatpush.bf16.msra.mxu1 %v3170_v11  ;;  %v3121_v32 = vld [vmem:[#allocation4 + $0x168] sm:$0xf]  ;;  %v3342_v11 = vor.u32 %v3804_v4, %v3339_v5  ;;  %v3091_v4 = vld [vmem:[#allocation4 + $0x138] sm:$0xf0] }
  0xe6   :  { %v3122_v41 = vor.u32 %v3751_v34, %v3121_v32  ;;  %v3297_v32 = vld [vmem:[#allocation4 + $0x2c8] sm:$0xf]  ;;  %v3795_v34 = vld [vmem:[#allocation4 + $0x2d4] sm:$0xf0] }
  0xe7   :  { %1958 = vmatpush.bf16.msrb.mxu3 %v3406_v25  ;;  %v3314_v25 = vor.u32 %v3799_v14, %v3313_v10  ;;  %v3217_v5 = vld [vmem:[#allocation4 + $0x228] sm:$0xf]  ;;  %v3737_v14 = vld [vmem:[#allocation4 + $0x10c] sm:$0xf] }
  0xe9   :  { %1975 = vmatpush.bf16.msra.mxu0 %v2962_v47  ;;  %1984 = vmatpush.bf16.msra.mxu1 %v3154_v22  ;;  %v3323_v22 = vld [vmem:[#allocation4 + $0x310] sm:$0xf0] }
  0xeb   :  { %1959 = vmatpush.bf16.msrb.mxu3 %v3390_v36  ;;  %v3326_v36 = vor.u32 %v3800_v21, %v3323_v22  ;;  %v3078_v22 = vor.u32 %v3737_v14, %v3075_v15  ;;  %v3825_v14 = vld [vmem:[#allocation4 + $0x3cc] sm:$0xf]  ;;  %v3427_v15 = vld [vmem:[#allocation4 + $0x3d8] sm:$0xf0] }
  0xed   :  { %1976 = vmatpush.bf16.msra.mxu0 %v2946_v1  ;;  %1985 = vmatpush.bf16.msra.mxu1 %v3138_v29  ;;  %v980_v44 = vpop.f32.mrf.mxu0  ;;  %v3709_v1 = vld [vmem:[#allocation4 + $0x2c] sm:$0xf]  ;;  %v3171_v29 = vld [vmem:[#allocation4 + $0x1d8] sm:$0xf0] }
  0xee   :  { %v981_v47 = vadd.f32 %v980_v44, %v207_v38  ;;  %v993_v48 = vpop.f32.mrf.mxu1  ;;  %v2966_v12 = vor.u32 %v3709_v1, %v2963_v2  ;;  %v3298_v38 = vor.u32 %v3795_v34, %v3297_v32  ;;  %v3299_v32 = vld [vmem:[#allocation4 + $0x2d8] sm:$0xf0] }
  0xef   :  { %1960 = vmatpush.bf16.msrb.mxu3 %v3374_v57  ;;  %v3265_v57 = vld [vmem:[#allocation4 + $0x288] sm:$0xf] }
  0xf0   :  { %1977 = vmatmul.bf16.vlgmr.msra.gmra.mxu0 %v4044_v33  ;;  %1938 = vmatmul.bf16.vlgmr.msrb.gmra.mxu1 %v4049_v0  ;;  %v994_v53 = vadd.f32 %v993_v48, %v981_v47  ;;  %v3787_v47 = vld [vmem:[#allocation4 + $0x294] sm:$0xf0]  ;;  %v3142_v48 = vor.u32 %v3753_v45, %v3139_v46 }
  0xf1   :  { %2021 = vmatpush.bf16.msrb.mxu0 %v3062_v7  ;;  %1986 = vmatpush.bf16.msra.mxu1 %v3122_v41  ;;  %v3281_v41 = vld [vmem:[#allocation4 + $0x2a8] sm:$0xf]  ;;  %v3266_v62 = vor.u32 %v3787_v47, %v3265_v57  ;;  %v3785_v57 = vld [vmem:[#allocation4 + $0x28c] sm:$0xf]  ;;  %v3267_v47 = vld [vmem:[#allocation4 + $0x298] sm:$0xf0] }
  0xf2   :  { %v3282_v44 = vor.u32 %v3791_v42, %v3281_v41  ;;  %v3789_v41 = vld [vmem:[#allocation4 + $0x2ac] sm:$0xf]  ;;  %v3283_v42 = vld [vmem:[#allocation4 + $0x2b8] sm:$0xf0] }
  0xf3   :  { %1961 = vmatpush.bf16.msrb.mxu3 %v3358_v56  ;;  %v3286_v45 = vor.u32 %v3789_v41, %v3283_v42 }
  0xf5   :  { %2022 = vmatpush.bf16.msrb.mxu0 %v3046_v17  ;;  %v1006_v59 = vpop.f32.mrf.mxu2  ;;  %1987 = vmatpush.bf16.msra.mxu1 %v3106_v51  ;;  %v982_v7 = vpop.f32.mrf.mxu0  ;;  %v3249_v51 = vld [vmem:[#allocation4 + $0x268] sm:$0xf] }
  0xf6   :  { %v1007_v61 = vadd.f32 %v1006_v59, %v994_v53  ;;  %v1019_v63 = vpop.f32.mrf.mxu3  ;;  %v995_v13 = vpop.f32.mrf.mxu1  ;;  %v3123_v53 = vld [vmem:[#allocation4 + $0x178] sm:$0xf0]  ;;  %v3250_v56 = vor.u32 %v3783_v52, %v3249_v51  ;;  %v3745_v59 = vld [vmem:[#allocation4 + $0x14c] sm:$0xf]  ;;  %v3377_v51 = vld [vmem:[#allocation4 + $0x368] sm:$0xf] }
  0xf7   :  { %1962 = vmatpush.bf16.msrb.mxu3 %v3342_v11  ;;  %v3815_v52 = vld [vmem:[#allocation4 + $0x374] sm:$0xf0] }
  0xf8   :  { %v1020_v6 = vadd.f32 %v1019_v63, %v1007_v61  ;;  %v3233_v61 = vld [vmem:[#allocation4 + $0x248] sm:$0xf]  ;;  %v3779_v63 = vld [vmem:[#allocation4 + $0x254] sm:$0xf0] }
  0xf9   :  { %2023 = vmatpush.bf16.msrb.mxu0 %v3030_v26  ;;  %1988 = vmatpush.bf16.msra.mxu1 %v3090_v3  ;;  %v2950_v26 = vor.u32 %v3705_v18, %v2947_v19  ;;  %v3234_v2 = vor.u32 %v3779_v63, %v3233_v61  ;;  %v3741_v3 = vld [vmem:[#allocation4 + $0x12c] sm:$0xf]  ;;  %v3771_v18 = vld [vmem:[#allocation4 + $0x214] sm:$0xf0] }
  0xfa   :  { %v1077_v17 = vmul.f32 0.01, %v1020_v6  ;;  %v3094_v11 = vor.u32 %v3741_v3, %v3091_v4  ;;  %v3797_v19 = vld [vmem:[#allocation4 + $0x2ec] sm:$0xf] }
  0xfb   :  { %1963 = vmatpush.bf16.msrb.mxu3 %v3326_v36  ;;  %v3773_v63 = vld [vmem:[#allocation4 + $0x22c] sm:$0xf] }
  0xfc   :  { %v1081_v23 = vmax.f32 %v1020_v6, %v1077_v17  ;;  %v3775_v6 = vld [vmem:[#allocation4 + $0x234] sm:$0xf0]  ;;  %v3201_v17 = vld [vmem:[#allocation4 + $0x208] sm:$0xf] }
  0xfd   :  { %2024 = vmatpush.bf16.msrb.mxu0 %v3014_v37  ;;  %v1008_v27 = vpop.f32.mrf.mxu2  ;;  %1989 = vmatpush.bf16.msra.mxu1 %v3074_v20  ;;  %v3174_v37 = vor.u32 %v3761_v28, %v3171_v29  ;;  %v3218_v13 = vor.u32 %v3775_v6, %v3217_v5  ;;  %v3315_v20 = vld [vmem:[#allocation4 + $0x2f8] sm:$0xf0]  ;;  %v3769_v5 = vld [vmem:[#allocation4 + $0x20c] sm:$0xf] }
  0xfe   :  { %v4055_v30 = vpack.c.bf16 %v1081_v23, %v1081_v23  ;;  %v1021_v31 = vpop.f32.mrf.mxu3  ;;  %v3441_v23 = vld [vmem:[#allocation4 + $0x3e8] sm:$0xf]  ;;  %v3318_v27 = vor.u32 %v3797_v19, %v3315_v20  ;;  %v3203_v6 = vld [vmem:[#allocation4 + $0x218] sm:$0xf0] }
  0xff   :  { %v3793_v31 = vld [vmem:[#allocation4 + $0x2cc] sm:$0xf] }
 0x100   :  { %1899 = vmatmul.bf16.vlgmr.msra.gmra.mxu2 %v4055_v30  ;;  %1990 = vmatmul.bf16.vlgmr.msra.gmra.mxu1 %v4049_v0  ;;  %v3302_v39 = vor.u32 %v3793_v31, %v3299_v32  ;;  %v3805_v31 = vld [vmem:[#allocation4 + $0x32c] sm:$0xf]  ;;  %v3347_v32 = vld [vmem:[#allocation4 + $0x338] sm:$0xf0] }
 0x101   :  { %2025 = vmatpush.bf16.msrb.mxu0 %v2998_v49  ;;  %2034 = vmatpush.bf16.msrb.mxu1 %v3190_v24  ;;  %v208_v49 = vperm.slane %v4041_v35, 3  ;;  %v3831_v24 = vld [vmem:[#allocation4 + $0x3f4] sm:$0xf0] }
 0x102   :  { %1995 = vmatpush.bf16.msra.mxu2 %v3314_v25  ;;  %v3202_v25 = vor.u32 %v3771_v18, %v3201_v17  ;;  %v3442_v29 = vor.u32 %v3831_v24, %v3441_v23  ;;  %v3821_v17 = vld [vmem:[#allocation4 + $0x3ac] sm:$0xf]  ;;  %v3411_v18 = vld [vmem:[#allocation4 + $0x3b8] sm:$0xf0] }
 0x103   :  { %v3414_v19 = vor.u32 %v3821_v17, %v3411_v18  ;;  %v3813_v24 = vld [vmem:[#allocation4 + $0x36c] sm:$0xf] }
 0x105   :  { %2026 = vmatpush.bf16.msrb.mxu0 %v2982_v60  ;;  %2035 = vmatpush.bf16.msrb.mxu1 %v3174_v37  ;;  %v3107_v60 = vld [vmem:[#allocation4 + $0x158] sm:$0xf0]  ;;  %v3425_v37 = vld [vmem:[#allocation4 + $0x3c8] sm:$0xf] }
 0x106   :  { %1996 = vmatpush.bf16.msra.mxu2 %v3298_v38  ;;  %v3110_v35 = vor.u32 %v3745_v59, %v3107_v60  ;;  %v3827_v38 = vld [vmem:[#allocation4 + $0x3d4] sm:$0xf0] }
 0x107   :  { %v3426_v40 = vor.u32 %v3827_v38, %v3425_v37  ;;  %v3811_v59 = vld [vmem:[#allocation4 + $0x354] sm:$0xf0]  ;;  %v3801_v37 = vld [vmem:[#allocation4 + $0x30c] sm:$0xf]  ;;  %v3331_v38 = vld [vmem:[#allocation4 + $0x318] sm:$0xf0] }
 0x109   :  { %2027 = vmatpush.bf16.msrb.mxu0 %v2966_v12  ;;  %2036 = vmatpush.bf16.msrb.mxu1 %v3158_v43  ;;  %v3409_v43 = vld [vmem:[#allocation4 + $0x3a8] sm:$0xf] }
 0x10a   :  { %1997 = vmatpush.bf16.msra.mxu2 %v3282_v44  ;;  %v3823_v44 = vld [vmem:[#allocation4 + $0x3b4] sm:$0xf0] }
 0x10b   :  { %v3410_v46 = vor.u32 %v3823_v44, %v3409_v43 }
 0x10d   :  { %2028 = vmatpush.bf16.msrb.mxu0 %v2950_v26  ;;  %v1032_v58 = vpop.f32.mrf.mxu0  ;;  %2037 = vmatpush.bf16.msrb.mxu1 %v3142_v48  ;;  %v3393_v48 = vld [vmem:[#allocation4 + $0x388] sm:$0xf] }
 0x10e   :  { %v1033_v54 = vadd.f32 %v1032_v58, %v208_v49  ;;  %v1045_v55 = vpop.f32.mrf.mxu1  ;;  %1998 = vmatpush.bf16.msra.mxu2 %v3266_v62  ;;  %v3819_v49 = vld [vmem:[#allocation4 + $0x394] sm:$0xf0]  ;;  %v3270_v62 = vor.u32 %v3785_v57, %v3267_v47 }
 0x110   :  { %2029 = vmatmul.bf16.vlgmr.msrb.gmra.mxu0 %v4044_v33  ;;  %v3126_v33 = vor.u32 %v3749_v50, %v3123_v53  ;;  %v1046_v1 = vadd.f32 %v1045_v55, %v1033_v54  ;;  %1951 = vmatmul.bf16.vlgmr.msrb.gmra.mxu2 %v4055_v30  ;;  %v3394_v50 = vor.u32 %v3819_v49, %v3393_v48  ;;  %v3251_v53 = vld [vmem:[#allocation4 + $0x278] sm:$0xf0]  ;;  %v3777_v54 = vld [vmem:[#allocation4 + $0x24c] sm:$0xf]  ;;  %v3836_v49 = vld [vmem:[#allocation6 + $0x20] sm:$0xff] }
 0x111   :  { %v3235_v55 = vld [vmem:[#allocation4 + $0x258] sm:$0xf0]  ;;  %v3837_v48 = vld [vmem:[#allocation6 + $0x28] sm:$0xff] }
 0x112   :  { %2038 = vmatpush.bf16.msrb.mxu1 %v3126_v33  ;;  %1999 = vmatpush.bf16.msra.mxu2 %v3250_v56  ;;  %v3378_v33 = vor.u32 %v3815_v52, %v3377_v51  ;;  %v3361_v56 = vld [vmem:[#allocation4 + $0x348] sm:$0xf]  ;;  %v3238_v60 = vor.u32 %v3777_v54, %v3235_v55  ;;  %v3832_v55 = vld [vmem:[#allocation6] sm:$0xff] }
 0x113   :  { %v3362_v61 = vor.u32 %v3811_v59, %v3361_v56  ;;  %v3844_v56 = vld [vmem:[#allocation6 + $0x60] sm:$0xff] }
 0x115   :  { %v1058_v7 = vpop.f32.mrf.mxu2  ;;  %v1034_v10 = vpop.f32.mrf.mxu0 }
 0x116   :  { %v1059_v8 = vadd.f32 %v1058_v7, %v1046_v1  ;;  %v1071_v9 = vpop.f32.mrf.mxu3  ;;  %2039 = vmatpush.bf16.msrb.mxu1 %v3110_v35  ;;  %v1047_v12 = vpop.f32.mrf.mxu1  ;;  %2000 = vmatpush.bf16.msra.mxu2 %v3234_v2  ;;  %v3219_v1 = vld [vmem:[#allocation4 + $0x238] sm:$0xf0]  ;;  %v3345_v35 = vld [vmem:[#allocation4 + $0x328] sm:$0xf]  ;;  %v3807_v2 = vld [vmem:[#allocation4 + $0x334] sm:$0xf0] }
 0x117   :  { %v3222_v3 = vor.u32 %v3773_v63, %v3219_v1  ;;  %v3346_v4 = vor.u32 %v3807_v2, %v3345_v35  ;;  %v3329_v7 = vld [vmem:[#allocation4 + $0x308] sm:$0xf]  ;;  %v3443_v10 = vld [vmem:[#allocation4 + $0x3f8] sm:$0xf0]  ;;  %v3842_v35 = vld [vmem:[#allocation6 + $0x50] sm:$0xff] }
 0x118   :  { %v1072_v16 = vadd.f32 %v1071_v9, %v1059_v8  ;;  %v3803_v8 = vld [vmem:[#allocation4 + $0x314] sm:$0xf0]  ;;  %v3829_v9 = vld [vmem:[#allocation4 + $0x3ec] sm:$0xf]  ;;  %v3854_v2 = vld [vmem:[#allocation6 + $0xb0] sm:$0xff] }
 0x119   :  { %v3330_v12 = vor.u32 %v3803_v8, %v3329_v7  ;;  %v3855_v63 = vld [vmem:[#allocation6 + $0xb8] sm:$0xff]  ;;  %v3840_v7 = vld [vmem:[#allocation6 + $0x40] sm:$0xff] }
 0x11a   :  { %v1078_v21 = vmul.f32 0.01, %v1072_v16  ;;  %2040 = vmatpush.bf16.msrb.mxu1 %v3094_v11  ;;  %2001 = vmatpush.bf16.msra.mxu2 %v3218_v13  ;;  %v3206_v11 = vor.u32 %v3769_v5, %v3203_v6  ;;  %v3446_v13 = vor.u32 %v3829_v9, %v3443_v10  ;;  %v4086_v6 = vld [vmem:[%s4108_s4] sm:$0xf]  ;;  %v3851_v10 = vld [vmem:[#allocation6 + $0x98] sm:$0xff] }
 0x11b   :  { %v3852_v8 = vld [vmem:[#allocation6 + $0xa0] sm:$0xff]  ;;  %v1217_v9 = vperm.slane %v4086_v6, 0 }
 0x11c   :  { %v1082_v26 = vmax.f32 %v1072_v16, %v1078_v21  ;;  %v3430_v16 = vor.u32 %v3825_v14, %v3427_v15  ;;  %v3817_v21 = vld [vmem:[#allocation4 + $0x38c] sm:$0xf]  ;;  %v3850_v14 = vld [vmem:[#allocation6 + $0x90] sm:$0xff] }
 0x11d   :  { %v1060_v28 = vpop.f32.mrf.mxu2 }
 0x11e   :  { %v4062_v34 = vpack.c.bf16 %v1082_v26, %v1082_v26  ;;  %v1073_v36 = vpop.f32.mrf.mxu3  ;;  %2041 = vmatpush.bf16.msrb.mxu1 %v3078_v22  ;;  %2002 = vmatpush.bf16.msra.mxu2 %v3202_v25  ;;  %v3395_v22 = vld [vmem:[#allocation4 + $0x398] sm:$0xf0]  ;;  %v3809_v28 = vld [vmem:[#allocation4 + $0x34c] sm:$0xf] }
 0x11f   :  { %v3398_v23 = vor.u32 %v3817_v21, %v3395_v22  ;;  %v3379_v25 = vld [vmem:[#allocation4 + $0x378] sm:$0xf0]  ;;  %v3350_v36 = vor.u32 %v3805_v31, %v3347_v32  ;;  %v3861_v32 = vld [vmem:[#allocation6 + $0xe8] sm:$0xff] }
 0x120   :  { %1912 = vmatmul.bf16.vlgmr.msra.gmra.mxu3 %v4062_v34  ;;  %v3382_v26 = vor.u32 %v3813_v24, %v3379_v25  ;;  %v3848_v25 = vld [vmem:[#allocation6 + $0x80] sm:$0xff] }
 0x121   :  { %2008 = vmatpush.bf16.msra.mxu3 %v3442_v29  ;;  %2042 = vmatmul.bf16.vlgmr.msrb.gmra.mxu1 %v4049_v0  ;;  %v3781_v0 = vld [vmem:[#allocation4 + $0x26c] sm:$0xf]  ;;  %v3363_v29 = vld [vmem:[#allocation4 + $0x358] sm:$0xf0] }
 0x122   :  { %2047 = vmatpush.bf16.msrb.mxu2 %v3318_v27  ;;  %v3254_v58 = vor.u32 %v3781_v0, %v3251_v53  ;;  %v3835_v0 = vld [vmem:[#allocation6 + $0x18] sm:$0xff]  ;;  %v3846_v53 = vld [vmem:[#allocation6 + $0x70] sm:$0xff] }
 0x123   :  { %2003 = vmatmul.bf16.vlgmr.msra.gmra.mxu2 %v4055_v30 }
 0x125   :  { %2009 = vmatpush.bf16.msra.mxu3 %v3426_v40  ;;  %v3334_v40 = vor.u32 %v3801_v37, %v3331_v38  ;;  %v3860_v38 = vld [vmem:[#allocation6 + $0xe0] sm:$0xff] }
 0x126   :  { %2048 = vmatpush.bf16.msrb.mxu2 %v3302_v39 }
 0x129   :  { %2010 = vmatpush.bf16.msra.mxu3 %v3410_v46  ;;  %v3838_v46 = vld [vmem:[#allocation6 + $0x30] sm:$0xff] }
 0x12a   :  { %2049 = vmatpush.bf16.msrb.mxu2 %v3286_v45  ;;  %v3839_v45 = vld [vmem:[#allocation6 + $0x38] sm:$0xff] }
 0x12b   :  { %2345 = vmatpush.bf16.msra.mxu0 %v3839_v45 }
 0x12d   :  { %2011 = vmatpush.bf16.msra.mxu3 %v3394_v50 }
 0x12e   :  { %2050 = vmatpush.bf16.msrb.mxu2 %v3270_v62  ;;  %v3847_v62 = vld [vmem:[#allocation6 + $0x78] sm:$0xff] }
 0x12f   :  { %2346 = vmatpush.bf16.msra.mxu0 %v3838_v46  ;;  %2358 = vmatpush.bf16.msra.mxu1 %v3847_v62  ;;  %v1219_v46 = vperm.slane %v4086_v6, 2  ;;  %v3857_v62 = vld [vmem:[#allocation6 + $0xc8] sm:$0xff] }
 0x130   :  { %1964 = vmatmul.bf16.vlgmr.msrb.gmra.mxu3 %v4062_v34 }
 0x131   :  { %2012 = vmatpush.bf16.msra.mxu3 %v3378_v33  ;;  %v3845_v33 = vld [vmem:[#allocation6 + $0x68] sm:$0xff] }
 0x132   :  { %2051 = vmatpush.bf16.msrb.mxu2 %v3254_v58  ;;  %v3833_v58 = vld [vmem:[#allocation6 + $0x8] sm:$0xff] }
 0x133   :  { %2347 = vmatpush.bf16.msra.mxu0 %v3837_v48  ;;  %2359 = vmatpush.bf16.msra.mxu1 %v3846_v53  ;;  %v3858_v48 = vld [vmem:[#allocation6 + $0xd0] sm:$0xff] }
 0x135   :  { %2013 = vmatpush.bf16.msra.mxu3 %v3362_v61  ;;  %v3843_v61 = vld [vmem:[#allocation6 + $0x58] sm:$0xff] }
 0x136   :  { %2052 = vmatpush.bf16.msrb.mxu2 %v3238_v60 }
 0x137   :  { %2348 = vmatpush.bf16.msra.mxu0 %v3836_v49  ;;  %2360 = vmatpush.bf16.msra.mxu1 %v3845_v33 }
 0x139   :  { %2014 = vmatpush.bf16.msra.mxu3 %v3346_v4  ;;  %v3853_v4 = vld [vmem:[#allocation6 + $0xa8] sm:$0xff] }
 0x13a   :  { %2053 = vmatpush.bf16.msrb.mxu2 %v3222_v3  ;;  %v3841_v3 = vld [vmem:[#allocation6 + $0x48] sm:$0xff] }
 0x13b   :  { %2349 = vmatpush.bf16.msra.mxu0 %v3835_v0  ;;  %2361 = vmatpush.bf16.msra.mxu1 %v3844_v56 }
 0x13d   :  { %2015 = vmatpush.bf16.msra.mxu3 %v3330_v12 }
 0x13e   :  { %2054 = vmatpush.bf16.msrb.mxu2 %v3206_v11 }
 0x13f   :  { %v4070_v20 = vpop.f32.mrf.mxu0  ;;  %2362 = vmatpush.bf16.msra.mxu1 %v3843_v61 }
 0x140   :  { %2016 = vmatmul.bf16.vlgmr.msra.gmra.mxu3 %v4062_v34  ;;  %v1875_v12 = vadd.f32 %v4070_v20, %v1217_v9 }
 0x141   :  { %2060 = vmatpush.bf16.msrb.mxu3 %v3446_v13  ;;  %2055 = vmatmul.bf16.vlgmr.msrb.gmra.mxu2 %v4055_v30  ;;  %v3366_v30 = vor.u32 %v3809_v28, %v3363_v29  ;;  %v3862_v29 = vld [vmem:[#allocation6 + $0xf0] sm:$0xff] }
 0x142   :  { %2371 = vmatpush.bf16.msra.mxu2 %v3855_v63 }
 0x143   :  { %2363 = vmatpush.bf16.msra.mxu1 %v3842_v35 }
 0x145   :  { %2061 = vmatpush.bf16.msrb.mxu3 %v3430_v16 }
 0x146   :  { %2372 = vmatpush.bf16.msra.mxu2 %v3854_v2 }
 0x147   :  { %v1876_v27 = vpop.f32.mrf.mxu0  ;;  %2364 = vmatpush.bf16.msra.mxu1 %v3841_v3 }
 0x148   :  { %v1218_v27 = vperm.slane %v4086_v6, 1 }
 0x149   :  { %2062 = vmatpush.bf16.msrb.mxu3 %v3414_v19  ;;  %v3849_v19 = vld [vmem:[#allocation6 + $0x88] sm:$0xff] }
 0x14a   :  { %2373 = vmatpush.bf16.msra.mxu2 %v3853_v4 }
 0x14b   :  { %2365 = vmatpush.bf16.msra.mxu1 %v3840_v7 }
 0x14d   :  { %2063 = vmatpush.bf16.msrb.mxu3 %v3398_v23 }
 0x14e   :  { %2374 = vmatpush.bf16.msra.mxu2 %v3852_v8 }
 0x14f   :  { %v4072_v39 = vpop.f32.mrf.mxu0 }
 0x150   :  { %v1927_v31 = vadd.f32 %v4072_v39, %v1218_v27 }
 0x151   :  { %2064 = vmatpush.bf16.msrb.mxu3 %v3382_v26  ;;  %v3863_v26 = vld [vmem:[#allocation6 + $0xf8] sm:$0xff] }
 0x152   :  { %2375 = vmatpush.bf16.msra.mxu2 %v3851_v10 }
 0x155   :  { %2065 = vmatpush.bf16.msrb.mxu3 %v3366_v30 }
 0x156   :  { %2376 = vmatpush.bf16.msra.mxu2 %v3850_v14 }
 0x157   :  { %v1928_v41 = vpop.f32.mrf.mxu0 }
 0x159   :  { %2066 = vmatpush.bf16.msrb.mxu3 %v3350_v36 }
 0x15a   :  { %2377 = vmatpush.bf16.msra.mxu2 %v3849_v19 }
 0x15d   :  { %2067 = vmatpush.bf16.msrb.mxu3 %v3334_v40  ;;  %v1887_v42 = vpop.f32.mrf.mxu1 }
 0x15e   :  { %v1888_v15 = vadd.f32 %v1887_v42, %v1875_v12  ;;  %2378 = vmatpush.bf16.msra.mxu2 %v3848_v25 }
 0x160   :  { %2068 = vmatmul.bf16.vlgmr.msrb.gmra.mxu3 %v4062_v34  ;;  %v3834_v34 = vld [vmem:[#allocation6 + $0x10] sm:$0xff] }
 0x161   :  { %2350 = vmatpush.bf16.msra.mxu0 %v3834_v34  ;;  %2384 = vmatpush.bf16.msra.mxu3 %v3863_v26 }
 0x165   :  { %v1889_v44 = vpop.f32.mrf.mxu1  ;;  %2351 = vmatpush.bf16.msra.mxu0 %v3833_v58  ;;  %2385 = vmatpush.bf16.msra.mxu3 %v3862_v29  ;;  %v3856_v58 = vld [vmem:[#allocation6 + $0xc0] sm:$0xff] }
 0x166   :  { %v3859_v44 = vld [vmem:[#allocation6 + $0xd8] sm:$0xff] }
 0x169   :  { %2352 = vmatpush.bf16.msra.mxu0 %v3832_v55  ;;  %2386 = vmatpush.bf16.msra.mxu3 %v3861_v32 }
 0x16d   :  { %v4075_v43 = vpop.f32.mrf.mxu0  ;;  %v4077_v47 = vpop.f32.mrf.mxu1  ;;  %2387 = vmatpush.bf16.msra.mxu3 %v3860_v38 }
 0x16e   :  { %v1940_v36 = vadd.f32 %v4077_v47, %v1927_v31  ;;  %v1979_v39 = vadd.f32 %v4075_v43, %v1219_v46 }
 0x171   :  { %2388 = vmatpush.bf16.msra.mxu3 %v3859_v44 }
 0x175   :  { %v1980_v57 = vpop.f32.mrf.mxu0  ;;  %v1941_v50 = vpop.f32.mrf.mxu1  ;;  %2389 = vmatpush.bf16.msra.mxu3 %v3858_v48 }
 0x179   :  { %2390 = vmatpush.bf16.msra.mxu3 %v3857_v62 }
 0x17d   :  { %v4079_v51 = vpop.f32.mrf.mxu1  ;;  %2391 = vmatpush.bf16.msra.mxu3 %v3856_v58 }
 0x17e   :  { %v1992_v47 = vadd.f32 %v4079_v51, %v1979_v39 }
 0x183   :  { %v1900_v54 = vpop.f32.mrf.mxu2 }
 0x184   :  { %v1901_v16 = vadd.f32 %v1900_v54, %v1888_v15 }
 0x185   :  { %v1993_v59 = vpop.f32.mrf.mxu1 }
 0x18b   :  { %v1902_v1 = vpop.f32.mrf.mxu2 }
 0x18d   :  { %v4081_v52 = vpop.f32.mrf.mxu0 }
 0x193   :  { %v1952_v5 = vpop.f32.mrf.mxu2 }
 0x194   :  { %v1953_v37 = vadd.f32 %v1952_v5, %v1940_v36 }
 0x195   :  { %v2032_v60 = vpop.f32.mrf.mxu0 }
 0x196   :  { %v1220_v60 = vperm.slane %v4086_v6, 3  ;;  %v3871_v6 = vld [vmem:[%s4110_s6] ss:$0 sm:$0xff] }
 0x198   :  { %v2031_v43 = vadd.f32 %v4081_v52, %v1220_v60 }
 0x19b   :  { %v1954_v11 = vpop.f32.mrf.mxu2 }
 0x19e   :  { %v2043_v13 = vpop.f32.mrf.mxu1 }
 0x19f   :  { %v2044_v61 = vadd.f32 %v2043_v13, %v2031_v43 }
 0x1a3   :  { %v1913_v17 = vpop.f32.mrf.mxu3 }
 0x1a4   :  { %v1914_v18 = vadd.f32 %v1913_v17, %v1901_v16 }
 0x1a6   :  { %v2004_v21 = vpop.f32.mrf.mxu2  ;;  %v2073_v22 = vmul.f32 0.01, %v1914_v18  ;;  %v2045_v23 = vpop.f32.mrf.mxu1 }
 0x1a7   :  { %v2005_v50 = vadd.f32 %v2004_v21, %v1992_v47 }
 0x1a8   :  { %v2077_v24 = vmax.f32 %v1914_v18, %v2073_v22 }
 0x1aa   :  { %v2081_v28 = vpack.c.bf16 %v2077_v24, %v2077_v24 }
 0x1ab   :  { %v1915_v20 = vpop.f32.mrf.mxu3 }
 0x1ac   :  { %2353 = vmatmul.bf16.vlgmr.msra.gmra.mxu0 %v2081_v28 }
 0x1ae   :  { %v2006_v30 = vpop.f32.mrf.mxu2 }
 0x1b3   :  { %v1965_v40 = vpop.f32.mrf.mxu3 }
 0x1b4   :  { %v1966_v41 = vadd.f32 %v1965_v40, %v1953_v37 }
 0x1b6   :  { %v2074_v42 = vmul.f32 0.01, %v1966_v41 }
 0x1b8   :  { %v2078_v45 = vmax.f32 %v1966_v41, %v2074_v42 }
 0x1ba   :  { %v2082_v57 = vpack.c.bf16 %v2078_v45, %v2078_v45 }
 0x1bb   :  { %v1967_v49 = vpop.f32.mrf.mxu3 }
 0x1bc   :  { %2366 = vmatmul.bf16.vlgmr.msra.gmra.mxu1 %v2082_v57 }
 0x1c3   :  { %v2017_v34 = vpop.f32.mrf.mxu3 }
 0x1c4   :  { %v2056_v0 = vpop.f32.mrf.mxu2  ;;  %v2018_v53 = vadd.f32 %v2017_v34, %v2005_v50 }
 0x1c5   :  { %v2057_v51 = vadd.f32 %v2056_v0, %v2044_v61 }
 0x1c6   :  { %v2075_v33 = vmul.f32 0.01, %v2018_v53 }
 0x1c8   :  { %v2079_v54 = vmax.f32 %v2018_v53, %v2075_v33 }
 0x1ca   :  { %v2083_v55 = vpack.c.bf16 %v2079_v54, %v2079_v54 }
 0x1cb   :  { %v2019_v59 = vpop.f32.mrf.mxu3 }
 0x1cc   :  { %v2058_v56 = vpop.f32.mrf.mxu2  ;;  %2379 = vmatmul.bf16.vlgmr.msra.gmra.mxu2 %v2083_v55 }
 0x1e3   :  { %v2069_v63 = vpop.f32.mrf.mxu3 }
 0x1e4   :  { %v2070_v1 = vadd.f32 %v2069_v63, %v2057_v51 }
 0x1e6   :  { %v2076_v35 = vmul.f32 0.01, %v2070_v1 }
 0x1e8   :  { %v2080_v2 = vmax.f32 %v2070_v1, %v2076_v35 }
 0x1ea   :  { %v2084_v3 = vpack.c.bf16 %v2080_v2, %v2080_v2 }
 0x1eb   :  { %v2071_v4 = vpop.f32.mrf.mxu3 }
 0x1ec   :  { %2392 = vmatmul.bf16.vlgmr.msra.gmra.mxu3 %v2084_v3 }
 0x229   :  { %v2354_v5 = vpop.f32.mrf.mxu0 }
 0x22a   :  { %v2355_v52 = vadd.f32 %v3871_v6, %v2354_v5 }
 0x231   :  { %v2356_v7 = vpop.f32.mrf.mxu0 }
 0x239   :  { %v2367_v8 = vpop.f32.mrf.mxu1 }
 0x23a   :  { %v2368_v12 = vadd.f32 %v2367_v8, %v2355_v52 }
 0x241   :  { %v2369_v9 = vpop.f32.mrf.mxu1 }
 0x24f   :  { %v2380_v10 = vpop.f32.mrf.mxu2 }
 0x250   :  { %v2381_v13 = vadd.f32 %v2380_v10, %v2368_v12 }
 0x257   :  { %v2382_v11 = vpop.f32.mrf.mxu2 }
 0x26f   :  { %v2393_v14 = vpop.f32.mrf.mxu3 }
 0x270   :  { %v2394_v15 = vadd.f32 %v2393_v14, %v2381_v13 }
 0x272   :  { %v3575_v16 = vmul.f32 -1.442695, %v2394_v15 }
 0x274   :  { %3872 = vpow2.f32 %v3575_v16 }
 0x277   :  { %v2395_v17 = vpop.f32.mrf.mxu3 }
 0x27a   :  { %v3873_v18 = vpop.eup %3872 }
 0x27b   :  { %v2400_v19 = vadd.f32 1.0, %v3873_v18 }
 0x27d   :  { %3874 = vrcp.f32 %v2400_v19  ;;  %v2412_v24 = vand.u32 2147483648, %v2400_v19  ;;  %v2410_v26 = vand.u32 2147483647, %v2400_v19  ;;  %vm2406_vm1 = vweird.f32 %v2400_v19 }
 0x27f   :  { %v2413_v28 = vor.u32 1.1754944e-38, %v2412_v24  ;;  %vm2411_vm3 = vcmp.eq.f32.partialorder %v2410_v26, 8.507059e+37 }
 0x283   :  { %v3875_v21 = vpop.eup %3874 }
 0x284   :  { %v2402_v22 = vmul.f32 %v3875_v21, %v2400_v19  ;;  %vm2407_vm0 = vweird.f32 %v3875_v21 }
 0x285   :  { %vm2408_vm2 = vmor %vm2406_vm1, %vm2407_vm0 }
 0x286   :  { %v2403_v23 = vsub.f32 1.0, %v2402_v22 }
 0x288   :  { %v2404_v25 = vmul.f32 %v3875_v21, %v2403_v23 }
 0x28a   :  { %v2405_v27 = vadd.f32 %v3875_v21, %v2404_v25 }
 0x28c   :  { %v2409_v20 = vsel %vm2408_vm2, %v3875_v21, %v2405_v27 }
 0x28d   :  { %v2414_v29 = vsel %vm2411_vm3, %v2413_v28, %v2409_v20 }
 0x28e   :  { %2416 = vst [vmem:[%s4111_s7] sm:$0xff] %v2414_v29 }
 0x28f   :  { %2421 = vsyncpa [#allocation3], 1 }
 0x290   :  { %2422 = vsyncpa [#allocation5], 1 }

</bundles_post_ra>
